<compile_context>
chip_gen: v5e
topology: v5e:2x2
jax: 0.10.0
libtpu: 0.0.40
codegen_flags: <defaults>
</compile_context>

<pallas_src>
import jax
import jax.numpy as jnp
from jax.experimental import pallas as pl
from jax.experimental.pallas import tpu as pltpu


def _round_up(v, m):
    return (v + m - 1) // m * m


def _pick_tile_h(H, W, Cin_p, TC, bpe_x, bpe_w, bpe_out, budget_bytes):
    """Largest divisor of H whose per-grid-step VMEM footprint fits the budget.

    NOTE: only exact divisors of H are considered, so an awkward (prime) H
    degrades to TH=1 — correct but slow.  VGG spatial sizes are all friendly.
    """
    def need(th):
        n = 2 * (th + 2) * (W + 2) * Cin_p * bpe_x    # input slab (double buffered)
        n += 2 * 9 * Cin_p * TC * bpe_w               # weight tile (double buffered)
        n += 2 * th * W * TC * bpe_out                # output block (double buffered)
        n += th * W * TC * 4                          # f32 accumulator (vregs / spill)
        n += th * W * max(Cin_p, 128) * bpe_x         # tap-load temporaries headroom
        return n

    best = 1
    for th in range(1, H + 1):
        if H % th == 0 and need(th) <= budget_bytes:
            best = th
    return best


def conv3x3_relu_kernel(x_ref, w_ref, b_ref, o_ref):
    # x_ref : (1, TH+2, W+2, Cin_p)  zero-padded, overlapping input slab
    # w_ref : (9*Cin_p, TC)          lane-dense 2-D weights, (ky, kx, cin)-major
    # b_ref : (1, TC)                f32 bias
    # o_ref : (1, TH, W, TC)         output tile
    TH = x_ref.shape[1] - 2
    W = x_ref.shape[2] - 2
    Cin_p = x_ref.shape[3]
    TC = o_ref.shape[3]

    acc = jnp.zeros((TH * W, TC), jnp.float32)
    # 3x3 conv as 9 accumulating MXU matmuls (K = Cin_p each); no im2col buffer.
    for ky in range(3):
        for kx in range(3):
            tap = x_ref[0, ky:ky + TH, kx:kx + W, :].reshape(TH * W, Cin_p)
            w_k = w_ref[(ky * 3 + kx) * Cin_p:(ky * 3 + kx + 1) * Cin_p, :]
            acc = acc + jnp.dot(tap, w_k, preferred_element_type=jnp.float32)

    acc = jnp.maximum(acc + b_ref[...], 0.0)          # bias + ReLU in f32 (VPU)
    o_ref[0] = acc.reshape(TH, W, TC).astype(o_ref.dtype)


def conv_module_forward(x_nchw, weight, bias, *, tile_h=None, use_bf16=False):
    """relu(conv2d(x, weight, bias, kernel=3, padding=1)) with PyTorch NCHW I/O.

    x_nchw : (N, Cin, H, W)    float32
    weight : (Cout, Cin, 3, 3) float32
    bias   : (Cout,)           float32
    returns: (N, Cout, H, W)   float32
    """
    N, Cin, H, W = x_nchw.shape
    Cout = weight.shape[0]

    # Channels: never inflate a small Cin to 128 (first-layer fix).  The channel
    # block always spans the full dim, so any Cin_p is legal; round small Cin to
    # a sublane-packing multiple of 16 only.
    Cin_p = _round_up(Cin, 16) if Cin <= 128 else _round_up(Cin, 128)
    Cout_p = _round_up(Cout, 128)                     # lane-dense output stores

    mx_dtype = jnp.bfloat16 if use_bf16 else jnp.float32
    bpe_x = jnp.dtype(mx_dtype).itemsize
    bpe_out = jnp.dtype(x_nchw.dtype).itemsize

    # Single wrapper pass: NCHW -> NHWC, one-pixel zero halo pad in H/W,
    # channel pad, optional bf16 cast.  The in-kernel halo assembly is gone.
    x = jnp.transpose(x_nchw, (0, 2, 3, 1))
    x = jnp.pad(x, ((0, 0), (1, 1), (1, 1), (0, Cin_p - Cin)))
    x = x.astype(mx_dtype)

    # Weights: OIHW -> (ky, kx, Cin_p, Cout_p) -> lane-dense 2-D (9*Cin_p, Cout_p).
    w = jnp.transpose(weight, (2, 3, 1, 0))
    w = jnp.pad(w, ((0, 0), (0, 0), (0, Cin_p - Cin), (0, Cout_p - Cout)))
    w2d = w.reshape(9 * Cin_p, Cout_p).astype(mx_dtype)
    b2d = jnp.pad(bias, (0, Cout_p - Cout)).reshape(1, Cout_p).astype(jnp.float32)

    # VMEM budget from the chip's real capacity: ~100 MiB on v5e/v6e (128 MiB
    # physical), ~51 MiB on v7x (64 MiB physical).
    try:
        vmem_cap = pltpu.get_tpu_info().vmem_capacity_bytes
    except Exception:
        vmem_cap = 64 * 1024 * 1024
    vmem_limit = min(int(vmem_cap * 0.8), 112 * 1024 * 1024)
    budget = int(vmem_limit * 0.8)

    # Prefer a single Cout tile so the weight tile is DMA'd exactly once and the
    # input taps are never re-read per Cout tile.
    if 2 * 9 * Cin_p * Cout_p * bpe_x <= budget // 3:
        TC = Cout_p
    else:
        TC = 256 if Cout_p % 256 == 0 else 128
    num_co = Cout_p // TC

    if tile_h is not None:
        assert H % tile_h == 0, "tile_h must divide H"
        TH = tile_h
    else:
        TH = _pick_tile_h(H, W, Cin_p, TC, bpe_x, bpe_x, bpe_out, budget)
        # Keep >= 2 parallel grid steps so v7x's two TensorCores both get work.
        if N * num_co * (H // TH) < 2 and TH == H and H % 2 == 0:
            TH = H // 2
    num_th = H // TH

    # Overlapping (TH+2)-row slabs, laid out contiguously in HBM so plain
    # Blocked BlockSpecs auto-pipeline them.  Whole-image tiles need no copy.
    if num_th == 1:
        x_exp = x
    else:
        rows = (jnp.arange(num_th)[:, None] * TH
                + jnp.arange(TH + 2)[None, :]).reshape(-1)
        x_exp = jnp.take(x, rows, axis=1)             # (N, num_th*(TH+2), W+2, Cin_p)

    out_nhwc = pl.pallas_call(
        conv3x3_relu_kernel,
        out_shape=jax.ShapeDtypeStruct((N, H, W, Cout_p), x_nchw.dtype),
        grid_spec=pltpu.PrefetchScalarGridSpec(
            num_scalar_prefetch=0,
            # Cout OUTERMOST: the (possibly multi-MB) weight tile is fetched
            # num_co times total, not once per (n, t) step.
            grid=(num_co, N, num_th),
            in_specs=[
                pl.BlockSpec((1, TH + 2, W + 2, Cin_p), lambda c, n, t: (n, t, 0, 0)),
                pl.BlockSpec((9 * Cin_p, TC), lambda c, n, t: (0, c)),
                pl.BlockSpec((1, TC), lambda c, n, t: (0, c)),
            ],
            out_specs=pl.BlockSpec((1, TH, W, TC), lambda c, n, t: (n, t, 0, c)),
        ),
        compiler_params=pltpu.CompilerParams(
            dimension_semantics=("parallel", "parallel", "parallel"),
            vmem_limit_bytes=vmem_limit),
    )(x_exp, w2d, b2d)

    out_nhwc = out_nhwc[..., :Cout]                   # drop Cout padding
    return jnp.transpose(out_nhwc, (0, 3, 1, 2))      # back to NCHW


if __name__ == "__main__":
    key = jax.random.PRNGKey(0)
    k_x, k_w, k_b = jax.random.split(key, 3)

    N, Cin, Cout, H, W = 2, 4, 8, 16, 16
    x = jax.random.normal(k_x, (N, Cin, H, W), dtype=jnp.float32)
    weight = 0.1 * jax.random.normal(k_w, (Cout, Cin, 3, 3), dtype=jnp.float32)
    bias = 0.1 * jax.random.normal(k_b, (Cout,), dtype=jnp.float32)

    # Plain-JAX reference.
    ref = jax.lax.conv_general_dilated(
        x, weight, window_strides=(1, 1), padding=((1, 1), (1, 1)),
        dimension_numbers=("NCHW", "OIHW", "NCHW"))
    ref = jnp.maximum(ref + bias[None, :, None, None], 0.0)

    # Auto-chosen tile (whole image fits one slab at these shapes).
    out = conv_module_forward(x, weight, bias)
    jax.block_until_ready(out)
    assert out.shape == (N, Cout, H, W)
    assert jnp.allclose(out, ref, atol=1e-4, rtol=1e-4)

    # Forced multi-tile run: exercises the overlapping-slab row-gather path.
    out_tiled = conv_module_forward(x, weight, bias, tile_h=8)
    jax.block_until_ready(out_tiled)
    assert jnp.allclose(out_tiled, ref, atol=1e-4, rtol=1e-4)

    # bf16 MXU path (f32 accumulate), looser tolerance vs. the f32 reference.
    out_bf16 = conv_module_forward(x, weight, bias, use_bf16=True)
    jax.block_until_ready(out_bf16)
    assert jnp.allclose(out_bf16, ref, atol=3e-2, rtol=3e-2)

    print("KERNEL_OK")
</pallas_src>

<mosaic_0001>
module attributes {stable_mosaic.version = 11 : i64} {
  func.func @conv3x3_relu_kernel(%arg0: i32, %arg1: i32, %arg2: i32, %arg3: memref<1x18x18x16xf32, #tpu.memory_space<vmem>>, %arg4: memref<144x128xf32, #tpu.memory_space<vmem>>, %arg5: memref<1x128xf32, #tpu.memory_space<vmem>>, %arg6: memref<1x16x16x128xf32, #tpu.memory_space<vmem>>) attributes {dimension_semantics = [#tpu.dimension_semantics<parallel>, #tpu.dimension_semantics<parallel>, #tpu.dimension_semantics<parallel>], iteration_bounds = array<i64: 1, 2, 1>, scalar_prefetch = 0 : i64, scratch_operands = 0 : i64, tpu.core_type = #tpu.core_type<tc>, window_params = [{transform_indices = @transform_0, window_bounds = array<i64: 1, 18, 18, 16>}, {transform_indices = @transform_1, window_bounds = array<i64: 144, 128>}, {transform_indices = @transform_2, window_bounds = array<i64: 1, 128>}, {transform_indices = @transform_3, window_bounds = array<i64: 1, 16, 16, 128>}]} {
    %cst = arith.constant 0.000000e+00 : f32
    %0 = vector.broadcast %cst : f32 to vector<256x128xf32>
    %c0 = arith.constant 0 : index
    %c0_0 = arith.constant 0 : index
    %c0_1 = arith.constant 0 : index
    %c0_2 = arith.constant 0 : index
    %1 = vector.load %arg3[%c0, %c0_0, %c0_1, %c0_2] : memref<1x18x18x16xf32, #tpu.memory_space<vmem>>, vector<1x16x16x16xf32>
    %2 = vector.shape_cast %1 : vector<1x16x16x16xf32> to vector<16x16x16xf32>
    %3 = vector.shape_cast %2 : vector<16x16x16xf32> to vector<256x16xf32>
    %c0_3 = arith.constant 0 : index
    %c0_4 = arith.constant 0 : index
    %4 = vector.load %arg4[%c0_3, %c0_4] : memref<144x128xf32, #tpu.memory_space<vmem>>, vector<16x128xf32>
    %cst_5 = arith.constant dense<0.000000e+00> : vector<256x128xf32>
    %5 = tpu.matmul %3, %4, %cst_5 {dimension_numbers = #tpu.dot_dimension_numbers<[1], [0], [0], [1], [0, 0, 1, 1], [], []>} : vector<256x16xf32>, vector<16x128xf32>, vector<256x128xf32> -> vector<256x128xf32>
    %6 = arith.addf %0, %5 : vector<256x128xf32>
    %c0_6 = arith.constant 0 : index
    %c0_7 = arith.constant 0 : index
    %c1 = arith.constant 1 : index
    %c0_8 = arith.constant 0 : index
    %7 = vector.load %arg3[%c0_6, %c0_7, %c1, %c0_8] : memref<1x18x18x16xf32, #tpu.memory_space<vmem>>, vector<1x16x16x16xf32>
    %8 = vector.shape_cast %7 : vector<1x16x16x16xf32> to vector<16x16x16xf32>
    %9 = vector.shape_cast %8 : vector<16x16x16xf32> to vector<256x16xf32>
    %c16 = arith.constant 16 : index
    %c0_9 = arith.constant 0 : index
    %10 = vector.load %arg4[%c16, %c0_9] : memref<144x128xf32, #tpu.memory_space<vmem>>, vector<16x128xf32>
    %cst_10 = arith.constant dense<0.000000e+00> : vector<256x128xf32>
    %11 = tpu.matmul %9, %10, %cst_10 {dimension_numbers = #tpu.dot_dimension_numbers<[1], [0], [0], [1], [0, 0, 1, 1], [], []>} : vector<256x16xf32>, vector<16x128xf32>, vector<256x128xf32> -> vector<256x128xf32>
    %12 = arith.addf %6, %11 : vector<256x128xf32>
    %c0_11 = arith.constant 0 : index
    %c0_12 = arith.constant 0 : index
    %c2 = arith.constant 2 : index
    %c0_13 = arith.constant 0 : index
    %13 = vector.load %arg3[%c0_11, %c0_12, %c2, %c0_13] : memref<1x18x18x16xf32, #tpu.memory_space<vmem>>, vector<1x16x16x16xf32>
    %14 = vector.shape_cast %13 : vector<1x16x16x16xf32> to vector<16x16x16xf32>
    %15 = vector.shape_cast %14 : vector<16x16x16xf32> to vector<256x16xf32>
    %c32 = arith.constant 32 : index
    %c0_14 = arith.constant 0 : index
    %16 = vector.load %arg4[%c32, %c0_14] : memref<144x128xf32, #tpu.memory_space<vmem>>, vector<16x128xf32>
    %cst_15 = arith.constant dense<0.000000e+00> : vector<256x128xf32>
    %17 = tpu.matmul %15, %16, %cst_15 {dimension_numbers = #tpu.dot_dimension_numbers<[1], [0], [0], [1], [0, 0, 1, 1], [], []>} : vector<256x16xf32>, vector<16x128xf32>, vector<256x128xf32> -> vector<256x128xf32>
    %18 = arith.addf %12, %17 : vector<256x128xf32>
    %c0_16 = arith.constant 0 : index
    %c1_17 = arith.constant 1 : index
    %c0_18 = arith.constant 0 : index
    %c0_19 = arith.constant 0 : index
    %19 = vector.load %arg3[%c0_16, %c1_17, %c0_18, %c0_19] : memref<1x18x18x16xf32, #tpu.memory_space<vmem>>, vector<1x16x16x16xf32>
    %20 = vector.shape_cast %19 : vector<1x16x16x16xf32> to vector<16x16x16xf32>
    %21 = vector.shape_cast %20 : vector<16x16x16xf32> to vector<256x16xf32>
    %c48 = arith.constant 48 : index
    %c0_20 = arith.constant 0 : index
    %22 = vector.load %arg4[%c48, %c0_20] : memref<144x128xf32, #tpu.memory_space<vmem>>, vector<16x128xf32>
    %cst_21 = arith.constant dense<0.000000e+00> : vector<256x128xf32>
    %23 = tpu.matmul %21, %22, %cst_21 {dimension_numbers = #tpu.dot_dimension_numbers<[1], [0], [0], [1], [0, 0, 1, 1], [], []>} : vector<256x16xf32>, vector<16x128xf32>, vector<256x128xf32> -> vector<256x128xf32>
    %24 = arith.addf %18, %23 : vector<256x128xf32>
    %c0_22 = arith.constant 0 : index
    %c1_23 = arith.constant 1 : index
    %c1_24 = arith.constant 1 : index
    %c0_25 = arith.constant 0 : index
    %25 = vector.load %arg3[%c0_22, %c1_23, %c1_24, %c0_25] : memref<1x18x18x16xf32, #tpu.memory_space<vmem>>, vector<1x16x16x16xf32>
    %26 = vector.shape_cast %25 : vector<1x16x16x16xf32> to vector<16x16x16xf32>
    %27 = vector.shape_cast %26 : vector<16x16x16xf32> to vector<256x16xf32>
    %c64 = arith.constant 64 : index
    %c0_26 = arith.constant 0 : index
    %28 = vector.load %arg4[%c64, %c0_26] : memref<144x128xf32, #tpu.memory_space<vmem>>, vector<16x128xf32>
    %cst_27 = arith.constant dense<0.000000e+00> : vector<256x128xf32>
    %29 = tpu.matmul %27, %28, %cst_27 {dimension_numbers = #tpu.dot_dimension_numbers<[1], [0], [0], [1], [0, 0, 1, 1], [], []>} : vector<256x16xf32>, vector<16x128xf32>, vector<256x128xf32> -> vector<256x128xf32>
    %30 = arith.addf %24, %29 : vector<256x128xf32>
    %c0_28 = arith.constant 0 : index
    %c1_29 = arith.constant 1 : index
    %c2_30 = arith.constant 2 : index
    %c0_31 = arith.constant 0 : index
    %31 = vector.load %arg3[%c0_28, %c1_29, %c2_30, %c0_31] : memref<1x18x18x16xf32, #tpu.memory_space<vmem>>, vector<1x16x16x16xf32>
    %32 = vector.shape_cast %31 : vector<1x16x16x16xf32> to vector<16x16x16xf32>
    %33 = vector.shape_cast %32 : vector<16x16x16xf32> to vector<256x16xf32>
    %c80 = arith.constant 80 : index
    %c0_32 = arith.constant 0 : index
    %34 = vector.load %arg4[%c80, %c0_32] : memref<144x128xf32, #tpu.memory_space<vmem>>, vector<16x128xf32>
    %cst_33 = arith.constant dense<0.000000e+00> : vector<256x128xf32>
    %35 = tpu.matmul %33, %34, %cst_33 {dimension_numbers = #tpu.dot_dimension_numbers<[1], [0], [0], [1], [0, 0, 1, 1], [], []>} : vector<256x16xf32>, vector<16x128xf32>, vector<256x128xf32> -> vector<256x128xf32>
    %36 = arith.addf %30, %35 : vector<256x128xf32>
    %c0_34 = arith.constant 0 : index
    %c2_35 = arith.constant 2 : index
    %c0_36 = arith.constant 0 : index
    %c0_37 = arith.constant 0 : index
    %37 = vector.load %arg3[%c0_34, %c2_35, %c0_36, %c0_37] : memref<1x18x18x16xf32, #tpu.memory_space<vmem>>, vector<1x16x16x16xf32>
    %38 = vector.shape_cast %37 : vector<1x16x16x16xf32> to vector<16x16x16xf32>
    %39 = vector.shape_cast %38 : vector<16x16x16xf32> to vector<256x16xf32>
    %c96 = arith.constant 96 : index
    %c0_38 = arith.constant 0 : index
    %40 = vector.load %arg4[%c96, %c0_38] : memref<144x128xf32, #tpu.memory_space<vmem>>, vector<16x128xf32>
    %cst_39 = arith.constant dense<0.000000e+00> : vector<256x128xf32>
    %41 = tpu.matmul %39, %40, %cst_39 {dimension_numbers = #tpu.dot_dimension_numbers<[1], [0], [0], [1], [0, 0, 1, 1], [], []>} : vector<256x16xf32>, vector<16x128xf32>, vector<256x128xf32> -> vector<256x128xf32>
    %42 = arith.addf %36, %41 : vector<256x128xf32>
    %c0_40 = arith.constant 0 : index
    %c2_41 = arith.constant 2 : index
    %c1_42 = arith.constant 1 : index
    %c0_43 = arith.constant 0 : index
    %43 = vector.load %arg3[%c0_40, %c2_41, %c1_42, %c0_43] : memref<1x18x18x16xf32, #tpu.memory_space<vmem>>, vector<1x16x16x16xf32>
    %44 = vector.shape_cast %43 : vector<1x16x16x16xf32> to vector<16x16x16xf32>
    %45 = vector.shape_cast %44 : vector<16x16x16xf32> to vector<256x16xf32>
    %c112 = arith.constant 112 : index
    %c0_44 = arith.constant 0 : index
    %46 = vector.load %arg4[%c112, %c0_44] : memref<144x128xf32, #tpu.memory_space<vmem>>, vector<16x128xf32>
    %cst_45 = arith.constant dense<0.000000e+00> : vector<256x128xf32>
    %47 = tpu.matmul %45, %46, %cst_45 {dimension_numbers = #tpu.dot_dimension_numbers<[1], [0], [0], [1], [0, 0, 1, 1], [], []>} : vector<256x16xf32>, vector<16x128xf32>, vector<256x128xf32> -> vector<256x128xf32>
    %48 = arith.addf %42, %47 : vector<256x128xf32>
    %c0_46 = arith.constant 0 : index
    %c2_47 = arith.constant 2 : index
    %c2_48 = arith.constant 2 : index
    %c0_49 = arith.constant 0 : index
    %49 = vector.load %arg3[%c0_46, %c2_47, %c2_48, %c0_49] : memref<1x18x18x16xf32, #tpu.memory_space<vmem>>, vector<1x16x16x16xf32>
    %50 = vector.shape_cast %49 : vector<1x16x16x16xf32> to vector<16x16x16xf32>
    %51 = vector.shape_cast %50 : vector<16x16x16xf32> to vector<256x16xf32>
    %c128 = arith.constant 128 : index
    %c0_50 = arith.constant 0 : index
    %52 = vector.load %arg4[%c128, %c0_50] : memref<144x128xf32, #tpu.memory_space<vmem>>, vector<16x128xf32>
    %cst_51 = arith.constant dense<0.000000e+00> : vector<256x128xf32>
    %53 = tpu.matmul %51, %52, %cst_51 {dimension_numbers = #tpu.dot_dimension_numbers<[1], [0], [0], [1], [0, 0, 1, 1], [], []>} : vector<256x16xf32>, vector<16x128xf32>, vector<256x128xf32> -> vector<256x128xf32>
    %54 = arith.addf %48, %53 : vector<256x128xf32>
    %c0_52 = arith.constant 0 : index
    %c0_53 = arith.constant 0 : index
    %55 = vector.load %arg5[%c0_52, %c0_53] : memref<1x128xf32, #tpu.memory_space<vmem>>, vector<1x128xf32>
    %56 = vector.broadcast %55 : vector<1x128xf32> to vector<256x128xf32>
    %57 = arith.addf %54, %56 : vector<256x128xf32>
    %cst_54 = arith.constant 0.000000e+00 : f32
    %58 = vector.broadcast %cst_54 : f32 to vector<256x128xf32>
    %59 = arith.maximumf %57, %58 : vector<256x128xf32>
    %60 = vector.shape_cast %59 : vector<256x128xf32> to vector<16x16x128xf32>
    %c0_55 = arith.constant 0 : index
    %c0_56 = arith.constant 0 : index
    %c0_57 = arith.constant 0 : index
    %c0_58 = arith.constant 0 : index
    %61 = vector.load %arg6[%c0_55, %c0_56, %c0_57, %c0_58] : memref<1x16x16x128xf32, #tpu.memory_space<vmem>>, vector<1x16x16x128xf32>
    %62 = vector.shape_cast %61 : vector<1x16x16x128xf32> to vector<16x16x128xf32>
    %63 = vector.shape_cast %60 : vector<16x16x128xf32> to vector<1x16x16x128xf32>
    tpu.vector_store %arg6[%c0_55, %c0_56, %c0_57, %c0_58], %63 {strides = array<i32>} : memref<1x16x16x128xf32, #tpu.memory_space<vmem>>, vector<1x16x16x128xf32>,
    return
  }
  func.func @transform_0(%arg0: i32, %arg1: i32, %arg2: i32) -> (i32, i32, i32, i32) {
    %c0_i32 = arith.constant 0 : i32
    %c0_i32_0 = arith.constant 0 : i32
    %c0_i32_1 = arith.constant 0 : i32
    return %arg1, %arg2, %c0_i32, %c0_i32_0 : i32, i32, i32, i32
  }
  func.func @transform_1(%arg0: i32, %arg1: i32, %arg2: i32) -> (i32, i32) {
    %c0_i32 = arith.constant 0 : i32
    %c0_i32_0 = arith.constant 0 : i32
    return %c0_i32, %arg0 : i32, i32
  }
  func.func @transform_2(%arg0: i32, %arg1: i32, %arg2: i32) -> (i32, i32) {
    %c0_i32 = arith.constant 0 : i32
    %c0_i32_0 = arith.constant 0 : i32
    return %c0_i32, %arg0 : i32, i32
  }
  func.func @transform_3(%arg0: i32, %arg1: i32, %arg2: i32) -> (i32, i32, i32, i32) {
    %c0_i32 = arith.constant 0 : i32
    %c0_i32_0 = arith.constant 0 : i32
    return %arg1, %arg2, %c0_i32, %arg0 : i32, i32, i32, i32
  }
}

</mosaic_0001>

<bundles_post_ra>
// kernel: tpu_custom_call.1
= control target key start
LH: loop header
LB: loop body
LE: loop exit
PB: predicated region body
PF: predicated region fallthrough
CT: control target
= control target key end

     0   :  { %8 = vsyncpa [#allocation3], 0  ;;  %s4799_s0 = inlined_call_operand.vmem [shape: f32[2,18,18,16], index: 0, kind: input, shape index: {}]   ;;  %s4800_s1 = inlined_call_operand.vmem [shape: f32[144,128], index: 1, kind: input, shape index: {}]   ;;  %s4801_s2 = inlined_call_operand.vmem [shape: f32[1,128], index: 2, kind: input, shape index: {}]   ;;  %s4802_s3 = inlined_call_operand.hbm [shape: f32[2,16,16,128], index: 3, kind: output, shape index: {}]  }
   0x1   :  { %10 = vsyncpa [#allocation3 + $0x1], 0  ;;  %s3552_s12 = smov 0   ;;  %s3554_s13 = smov 0  }
   0x2   :  { %s3556_s14 = smov 0   ;;  %s3558_s15 = smov 0  }
   0x3   :  { %s3560_s16 = smov 0   ;;  %s3562_s17 = smov 0  }
   0x4 LB: > { %s2890_s18 = sadd.s32 4294967295, %s3528_s17   ;;  %s2891_s19 = sadd.s32 4294967294, %s3528_s17   ;;  %s3528_s17 = sphi %s3562_s17, %s16_s17   ;;  %s3524_s16 = sphi %s3560_s16, %s4920_s16   ;;  %s3520_s15 = sphi %s3558_s15, %s4919_s15   ;;  %s3516_s14 = sphi %s3556_s14, %s4918_s14   ;;  %s3512_s13 = sphi %s3554_s13, %s4917_s13   ;;  %s3508_s12 = sphi %s3552_s12, %s4916_s12  }
   0x5   : > { %s31_s20 = sadd.s32 1, %s3524_s16  ;;  %s126_s21 = sadd.s32 1, %s3516_s14 }
   0x6   : > { %p33_p0 = scmp.ge.s32.totalorder %s31_s20, 2  ;;  %p136_p1 = scmp.ne.s32.totalorder %s3516_s14, %s3512_s13 }
   0x7   : > { %p137_p2 = scmp.eq.s32.totalorder %s2890_s18, 1  ;;  %p142_p3 = scmp.ne.s32.totalorder %s3512_s13, %s3508_s12 }
   0x8   : > { %s4922_s20 = smov (%p33_p0, %s31_s20), 0  ;;  %p143_p5 = scmp.eq.s32.totalorder %s2891_s19, 1 }
   0x9   : > { %p3592_p4 = por %p137_p2, %p136_p1  ;;  %s119_s23 = ssub.s32 %s3524_s16, %s4922_s20 }
   0xa   : > { %p2896_p6 = scmp.ge.s32.totalorder %s3528_s17, 1  ;;  %p124_p7 = scmp.eq.s32.totalorder %s119_s23, 0 }
   0xb   : > { %p3599_p8 = por %p143_p5, %p142_p3  ;;  %p188_p9 = scmp.lt.s32.totalorder %s3528_s17, 3 }
   0xc   : > { %s3605_s25 = scalar_select %p124_p7, %s3516_s14, %s126_s21  }
   0xd   : > { %p189_p10 = pnand %p2896_p6, %p188_p9 }
   0xf   : > { %192 = sbr.rel (%p189_p10) target bundleno = 743 (0x2e7), region = 32 }
  0x14   : > { %v310_v0 = vld [vmem:[%s4800_s1 + $0x18] sm:$0xff]  ;;  %v309_v1 = vld [vmem:[%s4800_s1 + $0x10] sm:$0xff]  ;;  %p225_p11 = scmp.lt.s32.totalorder %s3520_s15, 1  ;;  %v763_v2 = vld [vmem:[%s4800_s1 + $0x28] sm:$0xff]  ;;  %vm311_vm0 = vcmask 130048   ;;  %s221_s7 = sand.u32 1, %s3512_s13  }
  0x15   : > { %3385 = vmatpush.msra.mxu1 %v310_v0  ;;  %3386 = vmatpush.msra.mxu2 %v310_v0  ;;  %v1039_v3 = vld [vmem:[%s4800_s1 + $0x38] sm:$0xff]  ;;  %v276_v4 = vld [vmem:[%s4800_s1 + $0x8] sm:$0xff]  ;;  %v762_v10 = vld [vmem:[%s4800_s1 + $0x20] sm:$0xff] }
  0x16   : > { %3387 = vmatpush.msra.mxu3 %v310_v0  ;;  %s226_s5 = scalar_select %p225_p11, %s3520_s15, 1  ;;  %422 = vmatpush.msra.mxu0 %v310_v0  ;;  %v1314_v5 = vld [vmem:[%s4800_s1 + $0x48] sm:$0xff]  ;;  %v1038_v13 = vld [vmem:[%s4800_s1 + $0x30] sm:$0xff]  ;;  %v275_v16 = vld [vmem:[%s4800_s1] sm:$0xff] }
  0x17   : > { %3388 = vmatpush.msra.mxu1 %v309_v1  ;;  %3389 = vmatpush.msra.mxu2 %v309_v1  ;;  %v1313_v17 = vld [vmem:[%s4800_s1 + $0x40] sm:$0xff]  ;;  %v1865_v30 = vld [vmem:[%s4800_s1 + $0x68] sm:$0xff]  ;;  %v2140_v31 = vld [vmem:[%s4800_s1 + $0x78] sm:$0xff] }
  0x18   : > { %s3391_s10 = smul.u32 432, %s226_s5  ;;  %3390 = vmatpush.msra.mxu3 %v309_v1  ;;  %423 = vmatpush.msra.mxu0 %v309_v1  ;;  %v1589_v32 = vld [vmem:[%s4800_s1 + $0x58] sm:$0xff]  ;;  %v2415_v37 = vld [vmem:[%s4800_s1 + $0x88] sm:$0xff]  ;;  %s3470_s5 = scalar_lea.hbm %s4802_s3, 512 }
  0x19   : > { %874 = vmatpush.msrb.mxu2 %v763_v2  ;;  %631 = vmatpush.msrb.mxu1 %v276_v4 }
  0x1a   : > { %1150 = vmatpush.msrb.mxu3 %v1039_v3  ;;  %s3630_s23 = scalar_lea.vmem %s4799_s0, %s3391_s10  ;;  %1425 = vmatpush.msrb.mxu0 %v1314_v5  ;;  %s2897_s10 = sshll.u32 %s221_s7, 8 }
  0x1b   : > { %v3633_v6 = vld [vmem:[%s3630_s23 + $0x61] sm:$0xff]  ;;  %v3653_v11 = vld [vmem:[%s3630_s23 + $0x69] sm:$0xff]  ;;  %875 = vmatpush.msrb.mxu2 %v762_v10  ;;  %632 = vmatpush.msrb.mxu1 %v275_v16  ;;  %v3679_v18 = vld [vmem:[%s3630_s23 + $0x79] sm:$0xff]  ;;  %s4555_s11 = scalar_lea.vmem [#allocation2], %s2897_s10 }
  0x1c   : > { %v3636_v7 = vld [vmem:[%s3630_s23 + $0xc1] sm:$0xff]  ;;  %2907 = vmatmul.msk.f32.vlgmr.msra.gmra.mxu1 %vm311_vm0, %v3633_v6  ;;  %v3656_v12 = vld [vmem:[%s3630_s23 + $0xc9] sm:$0xff]  ;;  %1151 = vmatpush.msrb.mxu3 %v1038_v13  ;;  %v3682_v19 = vld [vmem:[%s3630_s23 + $0xd9] sm:$0xff]  ;;  %s2774_s26 = sshll.u32 %s4555_s11, 4  ;;  %s2775_s26 = int_to_ptr.vmem [resolvable:$true] %s2774_s26 }
  0x1d   : > { %v3639_v8 = vld [vmem:[%s3630_s23 + $0x121] sm:$0xff]  ;;  %2915 = vmatmul.msk.f32.vlgmr.msra.gmra.mxu2 %vm311_vm0, %v3636_v7  ;;  %v3662_v14 = vld [vmem:[%s3630_s23 + $0x129] sm:$0xff]  ;;  %1426 = vmatpush.msrb.mxu0 %v1313_v17  ;;  %v3685_v20 = vld [vmem:[%s3630_s23 + $0x139] sm:$0xff] }
  0x1e   : > { %v277_v9 = vld [vmem:[%s3630_s23 + $0x1] sm:$0xff]  ;;  %2923 = vmatmul.msk.f32.vlgmr.msra.gmra.mxu3 %vm311_vm0, %v3639_v8  ;;  %v278_v15 = vld [vmem:[%s3630_s23 + $0x9] sm:$0xff]  ;;  %v279_v21 = vld [vmem:[%s3630_s23 + $0x19] sm:$0xff]  ;;  %1976 = vmatpush.msra.mxu2 %v1865_v30 }
  0x1f   : > { %2899 = vmatmul.msk.f32.vlgmr.msra.gmra.mxu0 %vm311_vm0, %v277_v9  ;;  %v3696_v22 = vld [vmem:[%s3630_s23 + $0x81] sm:$0xff]  ;;  %v3713_v26 = vld [vmem:[%s3630_s23 + $0x91] sm:$0xff]  ;;  %2251 = vmatpush.msra.mxu3 %v2140_v31  ;;  %v3742_v33 = vld [vmem:[%s3630_s23 + $0x99] sm:$0xff] }
  0x20   : > { %v3699_v23 = vld [vmem:[%s3630_s23 + $0xe1] sm:$0xff]  ;;  %v3716_v27 = vld [vmem:[%s3630_s23 + $0xf1] sm:$0xff]  ;;  %1700 = vmatpush.msra.mxu1 %v1589_v32  ;;  %v3745_v34 = vld [vmem:[%s3630_s23 + $0xf9] sm:$0xff]  ;;  %2526 = vmatpush.msra.mxu0 %v2415_v37 }
  0x21   : > { %v3702_v24 = vld [vmem:[%s3630_s23 + $0x141] sm:$0xff]  ;;  %v3719_v28 = vld [vmem:[%s3630_s23 + $0x151] sm:$0xff]  ;;  %v3748_v35 = vld [vmem:[%s3630_s23 + $0x159] sm:$0xff] }
  0x22   : > { %v280_v25 = vld [vmem:[%s3630_s23 + $0x21] sm:$0xff]  ;;  %v3722_v29 = vld [vmem:[%s3630_s23 + $0x31] sm:$0xff]  ;;  %v3751_v36 = vld [vmem:[%s3630_s23 + $0x39] sm:$0xff] }
  0x23   : > { %v3765_v38 = vld [vmem:[%s3630_s23 + $0xa9] sm:$0xff]  ;;  %v3785_v42 = vld [vmem:[%s3630_s23 + $0xb1] sm:$0xff]  ;;  %v243_v46 = vld [vmem:[%s3630_s23] sm:$0xff] }
  0x24   : > { %2908 = vmatmul.msk.f32.gmra.mxu1 %vm311_vm0, %v3653_v11  ;;  %v3768_v39 = vld [vmem:[%s3630_s23 + $0x109] sm:$0xff]  ;;  %v3788_v43 = vld [vmem:[%s3630_s23 + $0x111] sm:$0xff]  ;;  %v2996_v51 = vld [vmem:[%s3630_s23 + $0x20] sm:$0xff] }
  0x25   : > { %2916 = vmatmul.msk.f32.gmra.mxu2 %vm311_vm0, %v3656_v12  ;;  %v3771_v40 = vld [vmem:[%s3630_s23 + $0x169] sm:$0xff]  ;;  %v3791_v44 = vld [vmem:[%s3630_s23 + $0x171] sm:$0xff]  ;;  %v3819_v52 = vld [vmem:[%s3630_s23 + $0x1a] sm:$0xff] }
  0x26   : > { %2924 = vmatmul.msk.f32.gmra.mxu3 %vm311_vm0, %v3662_v14  ;;  %v3774_v41 = vld [vmem:[%s3630_s23 + $0x49] sm:$0xff]  ;;  %v3794_v45 = vld [vmem:[%s3630_s23 + $0x51] sm:$0xff]  ;;  %v3859_v58 = vld [vmem:[%s3630_s23 + $0x3a] sm:$0xff] }
  0x27   : > { %2900 = vmatmul.msk.f32.gmra.mxu0 %vm311_vm0, %v278_v15  ;;  %v730_v47 = vld [vmem:[%s3630_s23 + $0x2] sm:$0xff]  ;;  %v2995_v48 = vld [vmem:[%s3630_s23 + $0x18] sm:$0xff]  ;;  %v731_v50 = vld [vmem:[%s3630_s23 + $0xa] sm:$0xff] }
  0x28   : > { %v244_v49 = vld [vmem:[%s3630_s23 + $0x8] sm:$0xff]  ;;  %v3822_v53 = vld [vmem:[%s3630_s23 + $0x30] sm:$0xff]  ;;  %v3835_v55 = vld [vmem:[%s3630_s23 + $0x38] sm:$0xff] }
  0x29   : > { %v3832_v54 = vld [vmem:[%s3630_s23 + $0x22] sm:$0xff]  ;;  %v3845_v56 = vld [vmem:[%s3630_s23 + $0x32] sm:$0xff]  ;;  %v3873_v60 = vld [vmem:[%s3630_s23 + $0x4a] sm:$0xff] }
  0x2a   : > { %v3848_v57 = vld [vmem:[%s3630_s23 + $0x48] sm:$0xff]  ;;  %v3862_v59 = vld [vmem:[%s3630_s23 + $0x50] sm:$0xff]  ;;  %v3876_v61 = vld [vmem:[%s3630_s23 + $0x60] sm:$0xff] }
  0x2b   : > { %v3887_v62 = vld [vmem:[%s3630_s23 + $0x52] sm:$0xff]  ;;  %v3890_v63 = vld [vmem:[%s3630_s23 + $0x68] sm:$0xff]  ;;  %v3928_v10 = vld [vmem:[%s3630_s23 + $0x80] sm:$0xff] }
  0x2c   : > { %2909 = vmatmul.msk.f32.gmra.mxu1 %vm311_vm0, %v3679_v18  ;;  %4830 = vst [vmem:[#allocation5_spill] sm:$0xff] %v3890_v63  ;;  %v3903_v1 = vld [vmem:[%s3630_s23 + $0x62] sm:$0xff]  ;;  %v3906_v2 = vld [vmem:[%s3630_s23 + $0x78] sm:$0xff]  ;;  %v3925_v9 = vld [vmem:[%s3630_s23 + $0x6a] sm:$0xff] }
  0x2d   : > { %2917 = vmatmul.msk.f32.gmra.mxu2 %vm311_vm0, %v3682_v19  ;;  %4831 = vst [vmem:[#allocation6_spill] sm:$0xff] %v3906_v2  ;;  %v3947_v17 = vld [vmem:[%s3630_s23 + $0x7a] sm:$0xff]  ;;  %v3969_v31 = vld [vmem:[%s3630_s23 + $0x82] sm:$0xff] }
  0x2e   : > { %2925 = vmatmul.msk.f32.gmra.mxu3 %vm311_vm0, %v3685_v20  ;;  %4833 = vst [vmem:[#allocation8_spill] sm:$0xff] %v3925_v9  ;;  %v3972_v32 = vld [vmem:[%s3630_s23 + $0x98] sm:$0xff] }
  0x2f   : > { %2901 = vmatmul.msk.f32.gmra.mxu0 %vm311_vm0, %v279_v21  ;;  %4834 = vst [vmem:[#allocation9_spill] sm:$0xff] %v3928_v10 }
  0x30   : > { %4836 = vst [vmem:[#allocation11_spill] sm:$0xff] %v3947_v17 }
  0x31   : > { %4839 = vst [vmem:[#allocation14_spill] sm:$0xff] %v3969_v31 }
  0x32   : > { %4840 = vst [vmem:[#allocation15_spill] sm:$0xff] %v3972_v32 }
  0x34   : > { %2910 = vmatmul.msk.f32.gmra.mxu1 %vm311_vm0, %v3696_v22 }
  0x35   : > { %2918 = vmatmul.msk.f32.gmra.mxu2 %vm311_vm0, %v3699_v23 }
  0x36   : > { %2926 = vmatmul.msk.f32.gmra.mxu3 %vm311_vm0, %v3702_v24 }
  0x37   : > { %2902 = vmatmul.msk.f32.gmra.mxu0 %vm311_vm0, %v280_v25 }
  0x3c   : > { %2911 = vmatmul.msk.f32.gmra.mxu1 %vm311_vm0, %v3713_v26 }
  0x3d   : > { %2919 = vmatmul.msk.f32.gmra.mxu2 %vm311_vm0, %v3716_v27 }
  0x3e   : > { %2927 = vmatmul.msk.f32.gmra.mxu3 %vm311_vm0, %v3719_v28 }
  0x3f   : > { %2903 = vmatmul.msk.f32.gmra.mxu0 %vm311_vm0, %v3722_v29 }
  0x44   : > { %2912 = vmatmul.msk.f32.gmra.mxu1 %vm311_vm0, %v3742_v33 }
  0x45   : > { %2920 = vmatmul.msk.f32.gmra.mxu2 %vm311_vm0, %v3745_v34 }
  0x46   : > { %2928 = vmatmul.msk.f32.gmra.mxu3 %vm311_vm0, %v3748_v35 }
  0x47   : > { %2904 = vmatmul.msk.f32.gmra.mxu0 %vm311_vm0, %v3751_v36 }
  0x4c   : > { %2913 = vmatmul.msk.f32.gmra.mxu1 %vm311_vm0, %v3765_v38 }
  0x4d   : > { %2921 = vmatmul.msk.f32.gmra.mxu2 %vm311_vm0, %v3768_v39 }
  0x4e   : > { %2929 = vmatmul.msk.f32.gmra.mxu3 %vm311_vm0, %v3771_v40 }
  0x4f   : > { %2905 = vmatmul.msk.f32.gmra.mxu0 %vm311_vm0, %v3774_v41 }
  0x54   : > { %2914 = vmatmul.msk.f32.gmra.mxu1 %vm311_vm0, %v3785_v42 }
  0x55   : > { %2922 = vmatmul.msk.f32.gmra.mxu2 %vm311_vm0, %v3788_v43 }
  0x56   : > { %2930 = vmatmul.msk.f32.gmra.mxu3 %vm311_vm0, %v3791_v44 }
  0x57   : > { %2906 = vmatmul.msk.f32.gmra.mxu0 %vm311_vm0, %v3794_v45 }
  0x5c   : > { %2931 = vmatmul.msk.f32.vlgmr.msrb.gmra.mxu1 %vm311_vm0, %v243_v46 }
  0x5d   : > { %2963 = vmatmul.msk.f32.vlgmr.msrb.gmra.mxu2 %vm311_vm0, %v730_v47 }
  0x5e   : > { %3027 = vmatmul.msk.f32.vlgmr.msrb.gmra.mxu3 %vm311_vm0, %v2995_v48 }
  0x5f   : > { %3091 = vmatmul.msk.f32.vlgmr.msrb.gmra.mxu0 %vm311_vm0, %v279_v21 }
  0x64   : > { %2932 = vmatmul.msk.f32.gmra.mxu1 %vm311_vm0, %v244_v49  ;;  %v3994_v49 = vld [vmem:[%s3630_s23 + $0xa8] sm:$0xff] }
  0x65   : > { %2964 = vmatmul.msk.f32.gmra.mxu2 %vm311_vm0, %v731_v50  ;;  %4843 = vst [vmem:[#allocation18_spill] sm:$0xff] %v3994_v49 }
  0x66   : > { %3028 = vmatmul.msk.f32.gmra.mxu3 %vm311_vm0, %v2996_v51 }
  0x67   : > { %3092 = vmatmul.msk.f32.gmra.mxu0 %vm311_vm0, %v280_v25 }
  0x6c   : > { %2933 = vmatmul.msk.f32.gmra.mxu1 %vm311_vm0, %v2995_v48  ;;  %v3991_v48 = vld [vmem:[%s3630_s23 + $0x92] sm:$0xff] }
  0x6d   : > { %2965 = vmatmul.msk.f32.gmra.mxu2 %vm311_vm0, %v3819_v52  ;;  %4842 = vst [vmem:[#allocation17_spill] sm:$0xff] %v3991_v48 }
  0x6e   : > { %3029 = vmatmul.msk.f32.gmra.mxu3 %vm311_vm0, %v3822_v53 }
  0x6f   : > { %3093 = vmatmul.msk.f32.gmra.mxu0 %vm311_vm0, %v3722_v29 }
  0x74   : > { %2934 = vmatmul.msk.f32.gmra.mxu1 %vm311_vm0, %v2996_v51  ;;  %v2139_v51 = vld [vmem:[%s4800_s1 + $0x70] sm:$0xff] }
  0x75   : > { %2966 = vmatmul.msk.f32.gmra.mxu2 %vm311_vm0, %v3832_v54  ;;  %2252 = vmatpush.msra.mxu3 %v2139_v51 }
  0x76   : > { %3030 = vmatmul.msk.f32.gmra.mxu3 %vm311_vm0, %v3835_v55 }
  0x77   : > { %3094 = vmatmul.msk.f32.gmra.mxu0 %vm311_vm0, %v3751_v36 }
  0x7c   : > { %2935 = vmatmul.msk.f32.gmra.mxu1 %vm311_vm0, %v3822_v53 }
  0x7d   : > { %2967 = vmatmul.msk.f32.gmra.mxu2 %vm311_vm0, %v3845_v56 }
  0x7e   : > { %3031 = vmatmul.msk.f32.gmra.mxu3 %vm311_vm0, %v3848_v57 }
  0x7f   : > { %3095 = vmatmul.msk.f32.gmra.mxu0 %vm311_vm0, %v3774_v41 }
  0x84   : > { %2936 = vmatmul.msk.f32.gmra.mxu1 %vm311_vm0, %v3835_v55 }
  0x85   : > { %2968 = vmatmul.msk.f32.gmra.mxu2 %vm311_vm0, %v3859_v58 }
  0x86   : > { %3032 = vmatmul.msk.f32.gmra.mxu3 %vm311_vm0, %v3862_v59 }
  0x87   : > { %3096 = vmatmul.msk.f32.gmra.mxu0 %vm311_vm0, %v3794_v45 }
  0x8c   : > { %2937 = vmatmul.msk.f32.gmra.mxu1 %vm311_vm0, %v3848_v57 }
  0x8d   : > { %2969 = vmatmul.msk.f32.gmra.mxu2 %vm311_vm0, %v3873_v60 }
  0x8e   : > { %3033 = vmatmul.msk.f32.gmra.mxu3 %vm311_vm0, %v3876_v61 }
  0x8f   : > { %3097 = vmatmul.msk.f32.gmra.mxu0 %vm311_vm0, %v3633_v6 }
  0x94   : > { %2938 = vmatmul.msk.f32.gmra.mxu1 %vm311_vm0, %v3862_v59 }
  0x95   : > { %2970 = vmatmul.msk.f32.gmra.mxu2 %vm311_vm0, %v3887_v62 }
  0x96   : > { %3034 = vmatmul.msk.f32.gmra.mxu3 %vm311_vm0, %v3890_v63 }
  0x97   : > { %3098 = vmatmul.msk.f32.gmra.mxu0 %vm311_vm0, %v3653_v11 }
  0x99   : > { %v3900_v0 = vpop.f32.mrf.mxu1 }
  0x9c   : > { %v3908_v3 = vpop.f32.mrf.mxu0  ;;  %2939 = vmatmul.msk.f32.gmra.mxu1 %vm311_vm0, %v3876_v61 }
  0x9d   : > { %2971 = vmatmul.msk.f32.gmra.mxu2 %vm311_vm0, %v3903_v1 }
  0x9e   : > { %3035 = vmatmul.msk.f32.gmra.mxu3 %vm311_vm0, %v3906_v2 }
  0x9f   : > { %3099 = vmatmul.msk.f32.gmra.mxu0 %vm311_vm0, %v3679_v18  ;;  %v3950_v18 = vld [vmem:[%s3630_s23 + $0x90] sm:$0xff] }
  0xa0   : > { %v3918_v4 = vpop.f32.mrf.mxu2  ;;  %4837 = vst [vmem:[#allocation12_spill] sm:$0xff] %v3950_v18 }
  0xa1   : > { %v3920_v5 = vpop.f32.mrf.mxu3  ;;  %v3922_v6 = vpop.f32.mrf.mxu1 }
  0xa2   : > { %4832 = vst [vmem:[#allocation7_spill] sm:$0xff] %v3920_v5 }
  0xa4   : > { %v3930_v11 = vpop.f32.mrf.mxu0  ;;  %2940 = vmatmul.msk.f32.gmra.mxu1 %vm311_vm0, %v3890_v63  ;;  %v4107_v63 = vld [vmem:[%s3630_s23 + $0xe0] sm:$0xff] }
  0xa5   : > { %2972 = vmatmul.msk.f32.gmra.mxu2 %vm311_vm0, %v3925_v9  ;;  %v4104_v9 = vld [vmem:[%s3630_s23 + $0xca] sm:$0xff] }
  0xa6   : > { %3036 = vmatmul.msk.f32.gmra.mxu3 %vm311_vm0, %v3928_v10 }
  0xa7   : > { %3100 = vmatmul.msk.f32.gmra.mxu0 %vm311_vm0, %v3696_v22 }
  0xa8   : > { %v3940_v13 = vpop.f32.mrf.mxu2 }
  0xa9   : > { %v3942_v15 = vpop.f32.mrf.mxu3  ;;  %v3944_v16 = vpop.f32.mrf.mxu1 }
  0xaa   : > { %4835 = vst [vmem:[#allocation10_spill] sm:$0xff] %v3942_v15  ;;  %v1588_v15 = vld [vmem:[%s4800_s1 + $0x50] sm:$0xff] }
  0xab   : > { %1701 = vmatpush.msra.mxu1 %v1588_v15  ;;  %v2414_v15 = vld [vmem:[%s4800_s1 + $0x80] sm:$0xff] }
  0xac   : > { %v3952_v21 = vpop.f32.mrf.mxu0  ;;  %2941 = vmatmul.msk.f32.gmra.mxu1 %vm311_vm0, %v3906_v2  ;;  %2527 = vmatpush.msra.mxu0 %v2414_v15  ;;  %v4092_v2 = vld [vmem:[%s3630_s23 + $0xd8] sm:$0xff] }
  0xad   : > { %2973 = vmatmul.msk.f32.gmra.mxu2 %vm311_vm0, %v3947_v17 }
  0xae   : > { %3037 = vmatmul.msk.f32.gmra.mxu3 %vm311_vm0, %v3950_v18 }
  0xaf   : > { %3101 = vmatmul.msk.f32.gmra.mxu0 %vm311_vm0, %v3713_v26 }
  0xb0   : > { %v3962_v22 = vpop.f32.mrf.mxu2 }
  0xb1   : > { %v3964_v25 = vpop.f32.mrf.mxu3  ;;  %v3966_v30 = vpop.f32.mrf.mxu1 }
  0xb2   : > { %4838 = vst [vmem:[#allocation13_spill] sm:$0xff] %v3964_v25 }
  0xb4   : > { %v3974_v37 = vpop.f32.mrf.mxu0  ;;  %2942 = vmatmul.msk.f32.gmra.mxu1 %vm311_vm0, %v3928_v10  ;;  %v4069_v10 = vld [vmem:[%s3630_s23 + $0xb2] sm:$0xff] }
  0xb5   : > { %2974 = vmatmul.msk.f32.gmra.mxu2 %vm311_vm0, %v3969_v31  ;;  %4854 = vst [vmem:[#allocation29_spill] sm:$0xff] %v4069_v10 }
  0xb6   : > { %3038 = vmatmul.msk.f32.gmra.mxu3 %vm311_vm0, %v3972_v32 }
  0xb7   : > { %3102 = vmatmul.msk.f32.gmra.mxu0 %vm311_vm0, %v3742_v33  ;;  %v1864_v33 = vld [vmem:[%s4800_s1 + $0x60] sm:$0xff] }
  0xb8   : > { %v3984_v26 = vpop.f32.mrf.mxu2  ;;  %1977 = vmatpush.msra.mxu2 %v1864_v33 }
  0xb9   : > { %v3986_v46 = vpop.f32.mrf.mxu3  ;;  %v3988_v47 = vpop.f32.mrf.mxu1 }
  0xba   : > { %4841 = vst [vmem:[#allocation16_spill] sm:$0xff] %v3986_v46 }
  0xbc   : > { %v3996_v50 = vpop.f32.mrf.mxu0  ;;  %2943 = vmatmul.msk.f32.gmra.mxu1 %vm311_vm0, %v3950_v18 }
  0xbd   : > { %2975 = vmatmul.msk.f32.gmra.mxu2 %vm311_vm0, %v3991_v48  ;;  %v4022_v48 = vld [vmem:[%s3630_s23 + $0x9a] sm:$0xff] }
  0xbe   : > { %3039 = vmatmul.msk.f32.gmra.mxu3 %vm311_vm0, %v3994_v49  ;;  %4846 = vst [vmem:[#allocation21_spill] sm:$0xff] %v4022_v48 }
  0xbf   : > { %3103 = vmatmul.msk.f32.gmra.mxu0 %vm311_vm0, %v3765_v38  ;;  %v4025_v38 = vld [vmem:[%s3630_s23 + $0xb0] sm:$0xff] }
  0xc0   : > { %v4012_v46 = vpop.f32.mrf.mxu2  ;;  %4847 = vst [vmem:[#allocation22_spill] sm:$0xff] %v4025_v38 }
  0xc1   : > { %4844 = vst [vmem:[#allocation19_spill] sm:$0xff] %v4012_v46  ;;  %v4014_v25 = vpop.f32.mrf.mxu3  ;;  %v4019_v5 = vpop.f32.mrf.mxu1 }
  0xc2   : > { %4845 = vst [vmem:[#allocation20_spill] sm:$0xff] %v4014_v25 }
  0xc4   : > { %v4027_v18 = vpop.f32.mrf.mxu0  ;;  %2944 = vmatmul.msk.f32.gmra.mxu1 %vm311_vm0, %v3972_v32  ;;  %v4050_v32 = vld [vmem:[%s3630_s23 + $0xc0] sm:$0xff] }
  0xc5   : > { %2976 = vmatmul.msk.f32.gmra.mxu2 %vm311_vm0, %v4022_v48  ;;  %v4047_v48 = vld [vmem:[%s3630_s23 + $0xaa] sm:$0xff]  ;;  %4851 = vst [vmem:[#allocation26_spill] sm:$0xff] %v4050_v32 }
  0xc6   : > { %3040 = vmatmul.msk.f32.gmra.mxu3 %vm311_vm0, %v4025_v38  ;;  %4850 = vst [vmem:[#allocation25_spill] sm:$0xff] %v4047_v48 }
  0xc7   : > { %3104 = vmatmul.msk.f32.gmra.mxu0 %vm311_vm0, %v3785_v42 }
  0xc8   : > { %v4040_v33 = vpop.f32.mrf.mxu2 }
  0xc9   : > { %4848 = vst [vmem:[#allocation23_spill] sm:$0xff] %v4040_v33  ;;  %v4042_v51 = vpop.f32.mrf.mxu3  ;;  %v4044_v25 = vpop.f32.mrf.mxu1 }
  0xca   : > { %4849 = vst [vmem:[#allocation24_spill] sm:$0xff] %v4042_v51 }
  0xcc   : > { %v4052_v31 = vpop.f32.mrf.mxu0  ;;  %2945 = vmatmul.msk.f32.gmra.mxu1 %vm311_vm0, %v3994_v49  ;;  %v4072_v49 = vld [vmem:[%s3630_s23 + $0xc8] sm:$0xff] }
  0xcd   : > { %2977 = vmatmul.msk.f32.gmra.mxu2 %vm311_vm0, %v4047_v48 }
  0xce   : > { %3041 = vmatmul.msk.f32.gmra.mxu3 %vm311_vm0, %v4050_v32 }
  0xcf   : > { %3105 = vmatmul.msk.f32.gmra.mxu0 %vm311_vm0, %v3636_v7 }
  0xd0   : > { %v4062_v42 = vpop.f32.mrf.mxu2 }
  0xd1   : > { %4852 = vst [vmem:[#allocation27_spill] sm:$0xff] %v4062_v42  ;;  %v4064_v15 = vpop.f32.mrf.mxu3  ;;  %v4066_v51 = vpop.f32.mrf.mxu1  ;;  %v4089_v42 = vld [vmem:[%s3630_s23 + $0xc2] sm:$0xff] }
  0xd2   : > { %4853 = vst [vmem:[#allocation28_spill] sm:$0xff] %v4064_v15 }
  0xd3   : > { %4857 = vst [vmem:[#allocation32_spill] sm:$0xff] %v4089_v42 }
  0xd4   : > { %v4074_v17 = vpop.f32.mrf.mxu0  ;;  %2946 = vmatmul.msk.f32.gmra.mxu1 %vm311_vm0, %v4025_v38 }
  0xd5   : > { %2978 = vmatmul.msk.f32.gmra.mxu2 %vm311_vm0, %v4069_v10 }
  0xd6   : > { %3042 = vmatmul.msk.f32.gmra.mxu3 %vm311_vm0, %v4072_v49 }
  0xd7   : > { %3106 = vmatmul.msk.f32.gmra.mxu0 %vm311_vm0, %v3656_v12 }
  0xd8   : > { %v4084_v7 = vpop.f32.mrf.mxu2 }
  0xd9   : > { %4855 = vst [vmem:[#allocation30_spill] sm:$0xff] %v4084_v7  ;;  %v4086_v15 = vpop.f32.mrf.mxu3  ;;  %v634_v48 = vpop.f32.mrf.mxu1 }
  0xda   : > { %4856 = vst [vmem:[#allocation31_spill] sm:$0xff] %v4086_v15  ;;  %v635_v12 = vadd.f32 %v634_v48, %v3908_v3 }
  0xdc   : > { %v1428_v38 = vpop.f32.mrf.mxu0  ;;  %2947 = vmatmul.msk.f32.gmra.mxu1 %vm311_vm0, %v4050_v32 }
  0xdd   : > { %2979 = vmatmul.msk.f32.gmra.mxu2 %vm311_vm0, %v4089_v42 }
  0xde   : > { %3043 = vmatmul.msk.f32.gmra.mxu3 %vm311_vm0, %v4092_v2 }
  0xdf   : > { %3107 = vmatmul.msk.f32.gmra.mxu0 %vm311_vm0, %v3682_v19 }
  0xe0   : > { %v877_v15 = vpop.f32.mrf.mxu2 }
  0xe1   : > { %v973_v10 = vadd.f32 %v877_v15, %v635_v12  ;;  %v1153_v7 = vpop.f32.mrf.mxu3  ;;  %v637_v33 = vpop.f32.mrf.mxu1 }
  0xe2   : > { %v638_v19 = vadd.f32 %v637_v33, %v3930_v11 }
  0xe3   : > { %v1249_v32 = vadd.f32 %v1153_v7, %v973_v10  ;;  %v4124_v7 = vld [vmem:[%s3630_s23 + $0xf0] sm:$0xff] }
  0xe4   : > { %v1431_v42 = vpop.f32.mrf.mxu0  ;;  %2948 = vmatmul.msk.f32.gmra.mxu1 %vm311_vm0, %v4072_v49 }
  0xe5   : > { %v4109_v46 = vadd.f32 %v1428_v38, %v1249_v32  ;;  %2980 = vmatmul.msk.f32.gmra.mxu2 %vm311_vm0, %v4104_v9  ;;  %v4121_v38 = vld [vmem:[%s3630_s23 + $0xda] sm:$0xff] }
  0xe6   : > { %3044 = vmatmul.msk.f32.gmra.mxu3 %vm311_vm0, %v4107_v63 }
  0xe7   : > { %4858 = vst [vmem:[#allocation33_spill] sm:$0xff] %v4109_v46  ;;  %3108 = vmatmul.msk.f32.gmra.mxu0 %vm311_vm0, %v3699_v23 }
  0xe8   : > { %v880_v3 = vpop.f32.mrf.mxu2 }
  0xe9   : > { %v974_v10 = vadd.f32 %v880_v3, %v638_v19  ;;  %v1156_v48 = vpop.f32.mrf.mxu3  ;;  %v640_v32 = vpop.f32.mrf.mxu1  ;;  %v4138_v3 = vld [vmem:[%s3630_s23 + $0xe2] sm:$0xff] }
  0xea   : > { %v641_v23 = vadd.f32 %v640_v32, %v3952_v21 }
  0xeb   : > { %v1250_v15 = vadd.f32 %v1156_v48, %v974_v10  ;;  %v4141_v48 = vld [vmem:[%s3630_s23 + $0xf8] sm:$0xff] }
  0xec   : > { %v1434_v12 = vpop.f32.mrf.mxu0  ;;  %2949 = vmatmul.msk.f32.gmra.mxu1 %vm311_vm0, %v4092_v2 }
  0xed   : > { %v4126_v46 = vadd.f32 %v1431_v42, %v1250_v15  ;;  %2981 = vmatmul.msk.f32.gmra.mxu2 %vm311_vm0, %v4121_v38 }
  0xee   : > { %3045 = vmatmul.msk.f32.gmra.mxu3 %vm311_vm0, %v4124_v7 }
  0xef   : > { %4859 = vst [vmem:[#allocation34_spill] sm:$0xff] %v4126_v46  ;;  %3109 = vmatmul.msk.f32.gmra.mxu0 %vm311_vm0, %v3716_v27 }
  0xf0   : > { %v883_v11 = vpop.f32.mrf.mxu2 }
  0xf1   : > { %v975_v33 = vadd.f32 %v883_v11, %v641_v23  ;;  %v1159_v19 = vpop.f32.mrf.mxu3  ;;  %v643_v42 = vpop.f32.mrf.mxu1  ;;  %v4155_v11 = vld [vmem:[%s3630_s23 + $0xf2] sm:$0xff] }
  0xf2   : > { %v644_v27 = vadd.f32 %v643_v42, %v3974_v37 }
  0xf3   : > { %v1251_v10 = vadd.f32 %v1159_v19, %v975_v33  ;;  %v4158_v19 = vld [vmem:[%s3630_s23 + $0x108] sm:$0xff] }
  0xf4   : > { %v1437_v15 = vpop.f32.mrf.mxu0  ;;  %2950 = vmatmul.msk.f32.gmra.mxu1 %vm311_vm0, %v4107_v63 }
  0xf5   : > { %v4143_v46 = vadd.f32 %v1434_v12, %v1251_v10  ;;  %2982 = vmatmul.msk.f32.gmra.mxu2 %vm311_vm0, %v4138_v3 }
  0xf6   : > { %3046 = vmatmul.msk.f32.gmra.mxu3 %vm311_vm0, %v4141_v48 }
  0xf7   : > { %4860 = vst [vmem:[#allocation35_spill] sm:$0xff] %v4143_v46  ;;  %3110 = vmatmul.msk.f32.gmra.mxu0 %vm311_vm0, %v3745_v34 }
  0xf8   : > { %v886_v21 = vpop.f32.mrf.mxu2 }
  0xf9   : > { %v976_v32 = vadd.f32 %v886_v21, %v644_v27  ;;  %v1162_v23 = vpop.f32.mrf.mxu3  ;;  %v646_v12 = vpop.f32.mrf.mxu1  ;;  %v4172_v21 = vld [vmem:[%s3630_s23 + $0xfa] sm:$0xff] }
  0xfa   : > { %v647_v34 = vadd.f32 %v646_v12, %v3996_v50 }
  0xfb   : > { %v1252_v33 = vadd.f32 %v1162_v23, %v976_v32  ;;  %v4175_v23 = vld [vmem:[%s3630_s23 + $0x110] sm:$0xff] }
  0xfc   : > { %v1440_v10 = vpop.f32.mrf.mxu0  ;;  %2951 = vmatmul.msk.f32.gmra.mxu1 %vm311_vm0, %v4124_v7 }
  0xfd   : > { %v4160_v46 = vadd.f32 %v1437_v15, %v1252_v33  ;;  %2983 = vmatmul.msk.f32.gmra.mxu2 %vm311_vm0, %v4155_v11 }
  0xfe   : > { %3047 = vmatmul.msk.f32.gmra.mxu3 %vm311_vm0, %v4158_v19 }
  0xff   : > { %4861 = vst [vmem:[#allocation36_spill] sm:$0xff] %v4160_v46  ;;  %3111 = vmatmul.msk.f32.gmra.mxu0 %vm311_vm0, %v3768_v39 }
 0x100   : > { %v889_v37 = vpop.f32.mrf.mxu2 }
 0x101   : > { %v977_v42 = vadd.f32 %v889_v37, %v647_v34  ;;  %v1165_v27 = vpop.f32.mrf.mxu3  ;;  %v649_v15 = vpop.f32.mrf.mxu1  ;;  %v4189_v37 = vld [vmem:[%s3630_s23 + $0x10a] sm:$0xff] }
 0x102   : > { %v650_v39 = vadd.f32 %v649_v15, %v4027_v18 }
 0x103   : > { %v1253_v32 = vadd.f32 %v1165_v27, %v977_v42  ;;  %v4192_v27 = vld [vmem:[%s3630_s23 + $0x120] sm:$0xff] }
 0x104   : > { %v1443_v33 = vpop.f32.mrf.mxu0  ;;  %2952 = vmatmul.msk.f32.gmra.mxu1 %vm311_vm0, %v4141_v48 }
 0x105   : > { %v4177_v46 = vadd.f32 %v1440_v10, %v1253_v32  ;;  %2984 = vmatmul.msk.f32.gmra.mxu2 %vm311_vm0, %v4172_v21 }
 0x106   : > { %3048 = vmatmul.msk.f32.gmra.mxu3 %vm311_vm0, %v4175_v23 }
 0x107   : > { %4862 = vst [vmem:[#allocation37_spill] sm:$0xff] %v4177_v46  ;;  %3112 = vmatmul.msk.f32.gmra.mxu0 %vm311_vm0, %v3788_v43 }
 0x108   : > { %v892_v50 = vpop.f32.mrf.mxu2 }
 0x109   : > { %v978_v12 = vadd.f32 %v892_v50, %v650_v39  ;;  %v1168_v34 = vpop.f32.mrf.mxu3  ;;  %v652_v10 = vpop.f32.mrf.mxu1  ;;  %v4206_v50 = vld [vmem:[%s3630_s23 + $0x112] sm:$0xff] }
 0x10a   : > { %v653_v43 = vadd.f32 %v652_v10, %v4052_v31 }
 0x10b   : > { %v1254_v42 = vadd.f32 %v1168_v34, %v978_v12  ;;  %v4209_v34 = vld [vmem:[%s3630_s23 + $0x128] sm:$0xff] }
 0x10c   : > { %v1446_v32 = vpop.f32.mrf.mxu0  ;;  %2953 = vmatmul.msk.f32.gmra.mxu1 %vm311_vm0, %v4158_v19 }
 0x10d   : > { %v4194_v46 = vadd.f32 %v1443_v33, %v1254_v42  ;;  %2985 = vmatmul.msk.f32.gmra.mxu2 %vm311_vm0, %v4189_v37 }
 0x10e   : > { %3049 = vmatmul.msk.f32.gmra.mxu3 %vm311_vm0, %v4192_v27 }
 0x10f   : > { %4863 = vst [vmem:[#allocation38_spill] sm:$0xff] %v4194_v46  ;;  %3113 = vmatmul.msk.f32.gmra.mxu0 %vm311_vm0, %v3639_v8 }
 0x110   : > { %v895_v18 = vpop.f32.mrf.mxu2 }
 0x111   : > { %v979_v15 = vadd.f32 %v895_v18, %v653_v43  ;;  %v1171_v39 = vpop.f32.mrf.mxu3  ;;  %v655_v33 = vpop.f32.mrf.mxu1  ;;  %v4223_v18 = vld [vmem:[%s3630_s23 + $0x122] sm:$0xff] }
 0x112   : > { %v656_v8 = vadd.f32 %v655_v33, %v4074_v17 }
 0x113   : > { %v1255_v12 = vadd.f32 %v1171_v39, %v979_v15  ;;  %v4226_v39 = vld [vmem:[%s3630_s23 + $0x138] sm:$0xff] }
 0x114   : > { %v1449_v42 = vpop.f32.mrf.mxu0  ;;  %2954 = vmatmul.msk.f32.gmra.mxu1 %vm311_vm0, %v4175_v23 }
 0x115   : > { %v4211_v46 = vadd.f32 %v1446_v32, %v1255_v12  ;;  %2986 = vmatmul.msk.f32.gmra.mxu2 %vm311_vm0, %v4206_v50 }
 0x116   : > { %3050 = vmatmul.msk.f32.gmra.mxu3 %vm311_vm0, %v4209_v34 }
 0x117   : > { %4864 = vst [vmem:[#allocation39_spill] sm:$0xff] %v4211_v46  ;;  %3114 = vmatmul.msk.f32.gmra.mxu0 %vm311_vm0, %v3662_v14 }
 0x118   : > { %v898_v31 = vpop.f32.mrf.mxu2 }
 0x119   : > { %v980_v10 = vadd.f32 %v898_v31, %v656_v8  ;;  %v1174_v43 = vpop.f32.mrf.mxu3  ;;  %v658_v32 = vpop.f32.mrf.mxu1  ;;  %v4240_v31 = vld [vmem:[%s3630_s23 + $0x12a] sm:$0xff] }
 0x11a   : > { %v659_v14 = vadd.f32 %v658_v32, %v3900_v0 }
 0x11b   : > { %v1256_v15 = vadd.f32 %v1174_v43, %v980_v10  ;;  %v4243_v43 = vld [vmem:[%s3630_s23 + $0x140] sm:$0xff] }
 0x11c   : > { %v1452_v12 = vpop.f32.mrf.mxu0  ;;  %2955 = vmatmul.msk.f32.gmra.mxu1 %vm311_vm0, %v4192_v27 }
 0x11d   : > { %v4228_v46 = vadd.f32 %v1449_v42, %v1256_v15  ;;  %2987 = vmatmul.msk.f32.gmra.mxu2 %vm311_vm0, %v4223_v18 }
 0x11e   : > { %3051 = vmatmul.msk.f32.gmra.mxu3 %vm311_vm0, %v4226_v39 }
 0x11f   : > { %4865 = vst [vmem:[#allocation40_spill] sm:$0xff] %v4228_v46  ;;  %3115 = vmatmul.msk.f32.gmra.mxu0 %vm311_vm0, %v3685_v20 }
 0x120   : > { %v901_v17 = vpop.f32.mrf.mxu2 }
 0x121   : > { %v981_v33 = vadd.f32 %v901_v17, %v659_v14  ;;  %v1177_v8 = vpop.f32.mrf.mxu3  ;;  %v661_v42 = vpop.f32.mrf.mxu1  ;;  %v4257_v17 = vld [vmem:[%s3630_s23 + $0x13a] sm:$0xff] }
 0x122   : > { %v662_v20 = vadd.f32 %v661_v42, %v3922_v6 }
 0x123   : > { %v1257_v10 = vadd.f32 %v1177_v8, %v981_v33  ;;  %v4260_v8 = vld [vmem:[%s3630_s23 + $0x150] sm:$0xff] }
 0x124   : > { %v1455_v15 = vpop.f32.mrf.mxu0  ;;  %2956 = vmatmul.msk.f32.gmra.mxu1 %vm311_vm0, %v4209_v34 }
 0x125   : > { %v4245_v46 = vadd.f32 %v1452_v12, %v1257_v10  ;;  %2988 = vmatmul.msk.f32.gmra.mxu2 %vm311_vm0, %v4240_v31 }
 0x126   : > { %3052 = vmatmul.msk.f32.gmra.mxu3 %vm311_vm0, %v4243_v43 }
 0x127   : > { %4866 = vst [vmem:[#allocation41_spill] sm:$0xff] %v4245_v46  ;;  %3116 = vmatmul.msk.f32.gmra.mxu0 %vm311_vm0, %v3702_v24 }
 0x128   : > { %v904_v0 = vpop.f32.mrf.mxu2 }
 0x129   : > { %v982_v32 = vadd.f32 %v904_v0, %v662_v20  ;;  %v1180_v14 = vpop.f32.mrf.mxu3  ;;  %v664_v12 = vpop.f32.mrf.mxu1  ;;  %v4274_v0 = vld [vmem:[%s3630_s23 + $0x142] sm:$0xff] }
 0x12a   : > { %v665_v24 = vadd.f32 %v664_v12, %v3944_v16 }
 0x12b   : > { %v1258_v33 = vadd.f32 %v1180_v14, %v982_v32  ;;  %v4277_v14 = vld [vmem:[%s3630_s23 + $0x158] sm:$0xff] }
 0x12c   : > { %v1458_v10 = vpop.f32.mrf.mxu0  ;;  %2957 = vmatmul.msk.f32.gmra.mxu1 %vm311_vm0, %v4226_v39 }
 0x12d   : > { %v4262_v46 = vadd.f32 %v1455_v15, %v1258_v33  ;;  %2989 = vmatmul.msk.f32.gmra.mxu2 %vm311_vm0, %v4257_v17 }
 0x12e   : > { %3053 = vmatmul.msk.f32.gmra.mxu3 %vm311_vm0, %v4260_v8 }
 0x12f   : > { %4867 = vst [vmem:[#allocation42_spill] sm:$0xff] %v4262_v46  ;;  %3117 = vmatmul.msk.f32.gmra.mxu0 %vm311_vm0, %v3719_v28 }
 0x130   : > { %v907_v6 = vpop.f32.mrf.mxu2 }
 0x131   : > { %v983_v42 = vadd.f32 %v907_v6, %v665_v24  ;;  %v1183_v20 = vpop.f32.mrf.mxu3  ;;  %v667_v15 = vpop.f32.mrf.mxu1  ;;  %v4291_v6 = vld [vmem:[%s3630_s23 + $0x152] sm:$0xff] }
 0x132   : > { %v668_v28 = vadd.f32 %v667_v15, %v3966_v30 }
 0x133   : > { %v1259_v32 = vadd.f32 %v1183_v20, %v983_v42  ;;  %v3023_v20 = vld [vmem:[%s3630_s23 + $0x168] sm:$0xff] }
 0x134   : > { %v1461_v33 = vpop.f32.mrf.mxu0  ;;  %2958 = vmatmul.msk.f32.gmra.mxu1 %vm311_vm0, %v4243_v43 }
 0x135   : > { %v4279_v46 = vadd.f32 %v1458_v10, %v1259_v32  ;;  %2990 = vmatmul.msk.f32.gmra.mxu2 %vm311_vm0, %v4274_v0 }
 0x136   : > { %3054 = vmatmul.msk.f32.gmra.mxu3 %vm311_vm0, %v4277_v14 }
 0x137   : > { %4868 = vst [vmem:[#allocation43_spill] sm:$0xff] %v4279_v46  ;;  %3118 = vmatmul.msk.f32.gmra.mxu0 %vm311_vm0, %v3748_v35 }
 0x138   : > { %v910_v16 = vpop.f32.mrf.mxu2 }
 0x139   : > { %v984_v12 = vadd.f32 %v910_v16, %v668_v28  ;;  %v1186_v24 = vpop.f32.mrf.mxu3  ;;  %v670_v10 = vpop.f32.mrf.mxu1 }
 0x13a   : > { %v671_v35 = vadd.f32 %v670_v10, %v3988_v47 }
 0x13b   : > { %v1260_v42 = vadd.f32 %v1186_v24, %v984_v12  ;;  %v3024_v24 = vld [vmem:[%s3630_s23 + $0x170] sm:$0xff] }
 0x13c   : > { %v1464_v32 = vpop.f32.mrf.mxu0  ;;  %2959 = vmatmul.msk.f32.gmra.mxu1 %vm311_vm0, %v4260_v8 }
 0x13d   : > { %v4294_v46 = vadd.f32 %v1461_v33, %v1260_v42  ;;  %2991 = vmatmul.msk.f32.gmra.mxu2 %vm311_vm0, %v4291_v6  ;;  %v4305_v33 = vld [vmem:[%s3630_s23 + $0x15a] sm:$0xff] }
 0x13e   : > { %3055 = vmatmul.msk.f32.gmra.mxu3 %vm311_vm0, %v3023_v20  ;;  %4870 = vst [vmem:[#allocation45_spill] sm:$0xff] %v4305_v33 }
 0x13f   : > { %4869 = vst [vmem:[#allocation44_spill] sm:$0xff] %v4294_v46  ;;  %3119 = vmatmul.msk.f32.gmra.mxu0 %vm311_vm0, %v3771_v40 }
 0x140   : > { %v913_v30 = vpop.f32.mrf.mxu2 }
 0x141   : > { %v985_v15 = vadd.f32 %v913_v30, %v671_v35  ;;  %v1189_v28 = vpop.f32.mrf.mxu3  ;;  %v673_v16 = vpop.f32.mrf.mxu1 }
 0x142   : > { %v674_v40 = vadd.f32 %v673_v16, %v4019_v5 }
 0x143   : > { %v1261_v12 = vadd.f32 %v1189_v28, %v985_v15  ;;  %v3025_v28 = vld [vmem:[%s3630_s23 + $0x180] sm:$0xff] }
 0x144   : > { %v1467_v42 = vpop.f32.mrf.mxu0  ;;  %2960 = vmatmul.msk.f32.gmra.mxu1 %vm311_vm0, %v4277_v14 }
 0x145   : > { %v4308_v46 = vadd.f32 %v1464_v32, %v1261_v12  ;;  %2992 = vmatmul.msk.f32.gmra.mxu2 %vm311_vm0, %v4305_v33  ;;  %v4319_v32 = vld [vmem:[%s3630_s23 + $0x16a] sm:$0xff] }
 0x146   : > { %3056 = vmatmul.msk.f32.gmra.mxu3 %vm311_vm0, %v3024_v24 }
 0x147   : > { %4871 = vst [vmem:[#allocation46_spill] sm:$0xff] %v4308_v46  ;;  %3120 = vmatmul.msk.f32.gmra.mxu0 %vm311_vm0, %v3791_v44  ;;  %v4323_v46 = vld [vmem:[%s3630_s23 + $0x181] sm:$0xff] }
 0x148   : > { %v916_v47 = vpop.f32.mrf.mxu2 }
 0x149   : > { %v986_v10 = vadd.f32 %v916_v47, %v674_v40  ;;  %v1192_v35 = vpop.f32.mrf.mxu3  ;;  %v676_v30 = vpop.f32.mrf.mxu1 }
 0x14a   : > { %v677_v44 = vadd.f32 %v676_v30, %v4044_v25 }
 0x14b   : > { %v1262_v15 = vadd.f32 %v1192_v35, %v986_v10  ;;  %v4335_v10 = vld [vmem:[%s3630_s23 + $0x172] sm:$0xff]  ;;  %v3026_v35 = vld [vmem:[%s3630_s23 + $0x188] sm:$0xff] }
 0x14c   : > { %v1470_v12 = vpop.f32.mrf.mxu0  ;;  %2961 = vmatmul.msk.f32.gmra.mxu1 %vm311_vm0, %v3023_v20  ;;  %v4339_v20 = vld [vmem:[%s3630_s23 + $0x189] sm:$0xff] }
 0x14d   : > { %v4325_v33 = vadd.f32 %v1467_v42, %v1262_v15  ;;  %2993 = vmatmul.msk.f32.gmra.mxu2 %vm311_vm0, %v4319_v32 }
 0x14e   : > { %3057 = vmatmul.msk.f32.gmra.mxu3 %vm311_vm0, %v3025_v28 }
 0x14f   : > { %4872 = vst [vmem:[#allocation47_spill] sm:$0xff] %v4325_v33  ;;  %3121 = vmatmul.msk.f32.gmra.mxu0 %vm311_vm0, %v4323_v46 }
 0x150   : > { %v919_v5 = vpop.f32.mrf.mxu2 }
 0x151   : > { %v987_v16 = vadd.f32 %v919_v5, %v677_v44  ;;  %v1195_v40 = vpop.f32.mrf.mxu3  ;;  %v679_v47 = vpop.f32.mrf.mxu1 }
 0x152   : > { %v680_v25 = vadd.f32 %v679_v47, %v4066_v51 }
 0x153   : > { %v1263_v42 = vadd.f32 %v1195_v40, %v987_v16 }
 0x154   : > { %v1473_v15 = vpop.f32.mrf.mxu0  ;;  %2962 = vmatmul.msk.f32.gmra.mxu1 %vm311_vm0, %v3024_v24 }
 0x155   : > { %v4341_v33 = vadd.f32 %v1470_v12, %v1263_v42  ;;  %2994 = vmatmul.msk.f32.gmra.mxu2 %vm311_vm0, %v4335_v10 }
 0x156   : > { %3058 = vmatmul.msk.f32.gmra.mxu3 %vm311_vm0, %v3026_v35 }
 0x157   : > { %3122 = vmatmul.msk.f32.gmra.mxu0 %vm311_vm0, %v4339_v20 }
 0x158   : > { %v922_v30 = vpop.f32.mrf.mxu2 }
 0x159   : > { %v988_v28 = vadd.f32 %v922_v30, %v680_v25  ;;  %v1198_v44 = vpop.f32.mrf.mxu3  ;;  %v682_v5 = vpop.f32.mrf.mxu1 }
 0x15a   : > { %v683_v51 = vadd.f32 %v682_v5, %v3918_v4 }
 0x15b   : > { %v1264_v16 = vadd.f32 %v1198_v44, %v988_v28 }
 0x15c   : > { %v1476_v40 = vpop.f32.mrf.mxu0  ;;  %3155 = vmatmul.msk.f32.vlgmr.msra.gmra.mxu1 %vm311_vm0, %v3819_v52 }
 0x15d   : > { %v4350_v12 = vadd.f32 %v1473_v15, %v1264_v16  ;;  %3219 = vmatmul.msk.f32.vlgmr.msra.gmra.mxu2 %vm311_vm0, %v3822_v53 }
 0x15e   : > { %3283 = vmatmul.msk.f32.vlgmr.msra.gmra.mxu3 %vm311_vm0, %v3722_v29 }
 0x15f   : > { %3347 = vmatmul.msk.f32.vlgmr.msra.gmra.mxu0 %vm311_vm0, %v3845_v56 }
 0x160   : > { %v925_v24 = vpop.f32.mrf.mxu2 }
 0x161   : > { %v989_v47 = vadd.f32 %v925_v24, %v683_v51  ;;  %v1201_v42 = vpop.f32.mrf.mxu3  ;;  %v685_v35 = vpop.f32.mrf.mxu1 }
 0x162   : > { %v686_v29 = vadd.f32 %v685_v35, %v3940_v13 }
 0x163   : > { %v1265_v15 = vadd.f32 %v1201_v42, %v989_v47 }
 0x164   : > { %v1479_v25 = vpop.f32.mrf.mxu0  ;;  %3156 = vmatmul.msk.f32.gmra.mxu1 %vm311_vm0, %v3832_v54 }
 0x165   : > { %v4361_v30 = vadd.f32 %v1476_v40, %v1265_v15  ;;  %3220 = vmatmul.msk.f32.gmra.mxu2 %vm311_vm0, %v3835_v55  ;;  %v3255_v15 = vld [vmem:[%s3630_s23 + $0x61] sm:$0xff] }
 0x166   : > { %3284 = vmatmul.msk.f32.gmra.mxu3 %vm311_vm0, %v3751_v36 }
 0x167   : > { %3348 = vmatmul.msk.f32.gmra.mxu0 %vm311_vm0, %v3859_v58 }
 0x168   : > { %v928_v52 = vpop.f32.mrf.mxu2 }
 0x169   : > { %v990_v53 = vadd.f32 %v928_v52, %v686_v29  ;;  %v1204_v4 = vpop.f32.mrf.mxu3  ;;  %v688_v28 = vpop.f32.mrf.mxu1 }
 0x16a   : > { %v689_v36 = vadd.f32 %v688_v28, %v3962_v22  ;;  %v3256_v28 = vld [vmem:[%s3630_s23 + $0x69] sm:$0xff] }
 0x16b   : > { %v1266_v44 = vadd.f32 %v1204_v4, %v990_v53 }
 0x16c   : > { %v1482_v5 = vpop.f32.mrf.mxu0  ;;  %3157 = vmatmul.msk.f32.gmra.mxu1 %vm311_vm0, %v3845_v56 }
 0x16d   : > { %v4372_v16 = vadd.f32 %v1479_v25, %v1266_v44  ;;  %3221 = vmatmul.msk.f32.gmra.mxu2 %vm311_vm0, %v3848_v57 }
 0x16e   : > { %3285 = vmatmul.msk.f32.gmra.mxu3 %vm311_vm0, %v3774_v41 }
 0x16f   : > { %3349 = vmatmul.msk.f32.gmra.mxu0 %vm311_vm0, %v3873_v60 }
 0x170   : > { %v931_v54 = vpop.f32.mrf.mxu2 }
 0x171   : > { %v991_v55 = vadd.f32 %v931_v54, %v689_v36  ;;  %v1207_v13 = vpop.f32.mrf.mxu3  ;;  %v691_v40 = vpop.f32.mrf.mxu1  ;;  %v4876_v36 = vld [vmem:[#allocation23_spill] sm:$0xff] }
 0x172   : > { %v692_v41 = vadd.f32 %v691_v40, %v3984_v26 }
 0x173   : > { %v1267_v51 = vadd.f32 %v1207_v13, %v991_v55 }
 0x174   : > { %v1485_v24 = vpop.f32.mrf.mxu0  ;;  %3158 = vmatmul.msk.f32.gmra.mxu1 %vm311_vm0, %v3859_v58 }
 0x175   : > { %v4383_v47 = vadd.f32 %v1482_v5, %v1267_v51  ;;  %3222 = vmatmul.msk.f32.gmra.mxu2 %vm311_vm0, %v3862_v59 }
 0x176   : > { %3286 = vmatmul.msk.f32.gmra.mxu3 %vm311_vm0, %v3794_v45  ;;  %v4873_v45 = vld [vmem:[#allocation19_spill] sm:$0xff] }
 0x177   : > { %3350 = vmatmul.msk.f32.gmra.mxu0 %vm311_vm0, %v3887_v62 }
 0x178   : > { %v934_v56 = vpop.f32.mrf.mxu2 }
 0x179   : > { %v992_v57 = vadd.f32 %v934_v56, %v692_v41  ;;  %v1210_v22 = vpop.f32.mrf.mxu3  ;;  %v694_v42 = vpop.f32.mrf.mxu1  ;;  %v3257_v41 = vld [vmem:[%s3630_s23 + $0x79] sm:$0xff] }
 0x17a   : > { %v695_v59 = vadd.f32 %v694_v42, %v4873_v45  ;;  %v4879_v42 = vld [vmem:[#allocation27_spill] sm:$0xff] }
 0x17b   : > { %v1268_v35 = vadd.f32 %v1210_v22, %v992_v57  ;;  %v4878_v22 = vld [vmem:[#allocation11_spill] sm:$0xff] }
 0x17c   : > { %v1488_v25 = vpop.f32.mrf.mxu0  ;;  %3159 = vmatmul.msk.f32.gmra.mxu1 %vm311_vm0, %v3873_v60  ;;  %v4874_v60 = vld [vmem:[#allocation5_spill] sm:$0xff] }
 0x17d   : > { %v4395_v58 = vadd.f32 %v1485_v24, %v1268_v35  ;;  %3223 = vmatmul.msk.f32.gmra.mxu2 %vm311_vm0, %v3876_v61  ;;  %v4875_v61 = vld [vmem:[#allocation8_spill] sm:$0xff] }
 0x17e   : > { %3287 = vmatmul.msk.f32.gmra.mxu3 %vm311_vm0, %v3255_v15 }
 0x17f   : > { %3351 = vmatmul.msk.f32.gmra.mxu0 %vm311_vm0, %v3903_v1 }
 0x180   : > { %v937_v26 = vpop.f32.mrf.mxu2 }
 0x181   : > { %v993_v29 = vadd.f32 %v937_v26, %v695_v59  ;;  %v1213_v52 = vpop.f32.mrf.mxu3  ;;  %v697_v53 = vpop.f32.mrf.mxu1 }
 0x182   : > { %v698_v54 = vadd.f32 %v697_v53, %v4876_v36 }
 0x183   : > { %v1269_v4 = vadd.f32 %v1213_v52, %v993_v29  ;;  %v3258_v29 = vld [vmem:[%s3630_s23 + $0x81] sm:$0xff] }
 0x184   : > { %v1491_v44 = vpop.f32.mrf.mxu0  ;;  %3160 = vmatmul.msk.f32.gmra.mxu1 %vm311_vm0, %v3887_v62  ;;  %v4877_v62 = vld [vmem:[#allocation6_spill] sm:$0xff] }
 0x185   : > { %v4406_v5 = vadd.f32 %v1488_v25, %v1269_v4  ;;  %3224 = vmatmul.msk.f32.gmra.mxu2 %vm311_vm0, %v4874_v60  ;;  %v4881_v4 = vld [vmem:[#allocation14_spill] sm:$0xff] }
 0x186   : > { %3288 = vmatmul.msk.f32.gmra.mxu3 %vm311_vm0, %v3256_v28  ;;  %v4882_v28 = vld [vmem:[#allocation30_spill] sm:$0xff] }
 0x187   : > { %3352 = vmatmul.msk.f32.gmra.mxu0 %vm311_vm0, %v4875_v61 }
 0x188   : > { %v940_v55 = vpop.f32.mrf.mxu2 }
 0x189   : > { %v994_v13 = vadd.f32 %v940_v55, %v698_v54  ;;  %v1216_v40 = vpop.f32.mrf.mxu3  ;;  %v700_v51 = vpop.f32.mrf.mxu1 }
 0x18a   : > { %v701_v35 = vadd.f32 %v700_v51, %v4879_v42 }
 0x18b   : > { %v1270_v24 = vadd.f32 %v1216_v40, %v994_v13  ;;  %v3259_v40 = vld [vmem:[%s3630_s23 + $0x91] sm:$0xff] }
 0x18c   : > { %v1494_v56 = vpop.f32.mrf.mxu0  ;;  %3161 = vmatmul.msk.f32.gmra.mxu1 %vm311_vm0, %v3903_v1  ;;  %v4880_v1 = vld [vmem:[#allocation9_spill] sm:$0xff] }
 0x18d   : > { %v4417_v57 = vadd.f32 %v1491_v44, %v1270_v24  ;;  %3225 = vmatmul.msk.f32.gmra.mxu2 %vm311_vm0, %v4877_v62 }
 0x18e   : > { %3289 = vmatmul.msk.f32.gmra.mxu3 %vm311_vm0, %v3257_v41  ;;  %v4884_v41 = vld [vmem:[#allocation17_spill] sm:$0xff] }
 0x18f   : > { %3353 = vmatmul.msk.f32.gmra.mxu0 %vm311_vm0, %v4878_v22 }
 0x190   : > { %v943_v15 = vpop.f32.mrf.mxu2 }
 0x191   : > { %v995_v25 = vadd.f32 %v943_v15, %v701_v35  ;;  %v1219_v45 = vpop.f32.mrf.mxu3  ;;  %v703_v59 = vpop.f32.mrf.mxu1 }
 0x192   : > { %v704_v44 = vadd.f32 %v703_v59, %v4882_v28  ;;  %v3260_v59 = vld [vmem:[%s3630_s23 + $0x99] sm:$0xff] }
 0x193   : > { %v1271_v26 = vadd.f32 %v1219_v45, %v995_v25 }
 0x194   : > { %v1497_v52 = vpop.f32.mrf.mxu0  ;;  %3162 = vmatmul.msk.f32.gmra.mxu1 %vm311_vm0, %v4875_v61  ;;  %v4883_v61 = vld [vmem:[#allocation12_spill] sm:$0xff] }
 0x195   : > { %v4428_v53 = vadd.f32 %v1494_v56, %v1271_v26  ;;  %3226 = vmatmul.msk.f32.gmra.mxu2 %vm311_vm0, %v4880_v1  ;;  %v4885_v56 = vld [vmem:[#allocation7_spill] sm:$0xff]  ;;  %v4888_v1 = vld [vmem:[#allocation10_spill] sm:$0xff] }
 0x196   : > { %3290 = vmatmul.msk.f32.gmra.mxu3 %vm311_vm0, %v3258_v29 }
 0x197   : > { %3354 = vmatmul.msk.f32.gmra.mxu0 %vm311_vm0, %v4881_v4 }
 0x198   : > { %v946_v60 = vpop.f32.mrf.mxu2 }
 0x199   : > { %v996_v36 = vadd.f32 %v946_v60, %v704_v44  ;;  %v1222_v54 = vpop.f32.mrf.mxu3  ;;  %v706_v55 = vpop.f32.mrf.mxu1 }
 0x19a   : > { %v707_v62 = vadd.f32 %v706_v55, %v4885_v56  ;;  %v4891_v56 = vld [vmem:[#allocation13_spill] sm:$0xff] }
 0x19b   : > { %v1272_v13 = vadd.f32 %v1222_v54, %v996_v36 }
 0x19c   : > { %v1500_v51 = vpop.f32.mrf.mxu0  ;;  %3163 = vmatmul.msk.f32.gmra.mxu1 %vm311_vm0, %v4878_v22  ;;  %v4886_v22 = vld [vmem:[#allocation15_spill] sm:$0xff] }
 0x19d   : > { %v4439_v24 = vadd.f32 %v1497_v52, %v1272_v13  ;;  %3227 = vmatmul.msk.f32.gmra.mxu2 %vm311_vm0, %v4883_v61  ;;  %v4887_v52 = vld [vmem:[#allocation21_spill] sm:$0xff]  ;;  %v3261_v13 = vld [vmem:[%s3630_s23 + $0xa9] sm:$0xff] }
 0x19e   : > { %3291 = vmatmul.msk.f32.gmra.mxu3 %vm311_vm0, %v3259_v40  ;;  %v4890_v61 = vld [vmem:[#allocation25_spill] sm:$0xff] }
 0x19f   : > { %3355 = vmatmul.msk.f32.gmra.mxu0 %vm311_vm0, %v4884_v41 }
 0x1a0   : > { %v949_v42 = vpop.f32.mrf.mxu2 }
 0x1a1   : > { %v997_v35 = vadd.f32 %v949_v42, %v707_v62  ;;  %v1225_v15 = vpop.f32.mrf.mxu3  ;;  %v709_v25 = vpop.f32.mrf.mxu1 }
 0x1a2   : > { %v710_v28 = vadd.f32 %v709_v25, %v4888_v1  ;;  %v4893_v1 = vld [vmem:[#allocation29_spill] sm:$0xff] }
 0x1a3   : > { %v1273_v45 = vadd.f32 %v1225_v15, %v997_v35 }
 0x1a4   : > { %v1503_v26 = vpop.f32.mrf.mxu0  ;;  %3164 = vmatmul.msk.f32.gmra.mxu1 %vm311_vm0, %v4881_v4  ;;  %v4889_v4 = vld [vmem:[#allocation18_spill] sm:$0xff] }
 0x1a5   : > { %v4450_v29 = vadd.f32 %v1500_v51, %v1273_v45  ;;  %3228 = vmatmul.msk.f32.gmra.mxu2 %vm311_vm0, %v4886_v22 }
 0x1a6   : > { %3292 = vmatmul.msk.f32.gmra.mxu3 %vm311_vm0, %v3260_v59  ;;  %v3262_v59 = vld [vmem:[%s3630_s23 + $0xb1] sm:$0xff] }
 0x1a7   : > { %3356 = vmatmul.msk.f32.gmra.mxu0 %vm311_vm0, %v4887_v52 }
 0x1a8   : > { %v952_v44 = vpop.f32.mrf.mxu2 }
 0x1a9   : > { %v998_v60 = vadd.f32 %v952_v44, %v710_v28  ;;  %v1228_v36 = vpop.f32.mrf.mxu3  ;;  %v712_v54 = vpop.f32.mrf.mxu1  ;;  %v4894_v28 = vld [vmem:[#allocation16_spill] sm:$0xff] }
 0x1aa   : > { %v713_v62 = vadd.f32 %v712_v54, %v4891_v56 }
 0x1ab   : > { %v1274_v55 = vadd.f32 %v1228_v36, %v998_v60 }
 0x1ac   : > { %v1506_v40 = vpop.f32.mrf.mxu0  ;;  %3165 = vmatmul.msk.f32.gmra.mxu1 %vm311_vm0, %v4884_v41  ;;  %v4892_v41 = vld [vmem:[#allocation22_spill] sm:$0xff] }
 0x1ad   : > { %v4461_v51 = vadd.f32 %v1503_v26, %v1274_v55  ;;  %3229 = vmatmul.msk.f32.gmra.mxu2 %vm311_vm0, %v4889_v4 }
 0x1ae   : > { %3293 = vmatmul.msk.f32.gmra.mxu3 %vm311_vm0, %v3261_v13 }
 0x1af   : > { %3357 = vmatmul.msk.f32.gmra.mxu0 %vm311_vm0, %v4890_v61 }
 0x1b0   : > { %v955_v42 = vpop.f32.mrf.mxu2 }
 0x1b1   : > { %v999_v35 = vadd.f32 %v955_v42, %v713_v62  ;;  %v1231_v15 = vpop.f32.mrf.mxu3  ;;  %v715_v25 = vpop.f32.mrf.mxu1  ;;  %v4896_v62 = vld [vmem:[#allocation32_spill] sm:$0xff] }
 0x1b2   : > { %v716_v44 = vadd.f32 %v715_v25, %v4894_v28  ;;  %v4897_v42 = vld [vmem:[#allocation20_spill] sm:$0xff] }
 0x1b3   : > { %v1275_v45 = vadd.f32 %v1231_v15, %v999_v35 }
 0x1b4   : > { %v1509_v26 = vpop.f32.mrf.mxu0  ;;  %3166 = vmatmul.msk.f32.gmra.mxu1 %vm311_vm0, %v4887_v52  ;;  %v4895_v52 = vld [vmem:[#allocation26_spill] sm:$0xff] }
 0x1b5   : > { %v4472_v22 = vadd.f32 %v1506_v40, %v1275_v45  ;;  %3230 = vmatmul.msk.f32.gmra.mxu2 %vm311_vm0, %v4892_v41  ;;  %v3263_v40 = vld [vmem:[%s3630_s23 + $0xc1] sm:$0xff]  ;;  %v3264_v41 = vld [vmem:[%s3630_s23 + $0xc9] sm:$0xff] }
 0x1b6   : > { %3294 = vmatmul.msk.f32.gmra.mxu3 %vm311_vm0, %v3262_v59 }
 0x1b7   : > { %3358 = vmatmul.msk.f32.gmra.mxu0 %vm311_vm0, %v4893_v1 }
 0x1b8   : > { %v958_v60 = vpop.f32.mrf.mxu2 }
 0x1b9   : > { %v1000_v36 = vadd.f32 %v958_v60, %v716_v44  ;;  %v1234_v54 = vpop.f32.mrf.mxu3  ;;  %v718_v55 = vpop.f32.mrf.mxu1 }
 0x1ba   : > { %v719_v35 = vadd.f32 %v718_v55, %v4897_v42 }
 0x1bb   : > { %v1276_v13 = vadd.f32 %v1234_v54, %v1000_v36 }
 0x1bc   : > { %v1512_v4 = vpop.f32.mrf.mxu0  ;;  %3167 = vmatmul.msk.f32.gmra.mxu1 %vm311_vm0, %v4890_v61  ;;  %v4898_v61 = vld [vmem:[#allocation24_spill] sm:$0xff] }
 0x1bd   : > { %v4483_v56 = vadd.f32 %v1509_v26, %v1276_v13  ;;  %3231 = vmatmul.msk.f32.gmra.mxu2 %vm311_vm0, %v4895_v52 }
 0x1be   : > { %3295 = vmatmul.msk.f32.gmra.mxu3 %vm311_vm0, %v3263_v40 }
 0x1bf   : > { %3359 = vmatmul.msk.f32.gmra.mxu0 %vm311_vm0, %v4896_v62 }
 0x1c0   : > { %v961_v15 = vpop.f32.mrf.mxu2 }
 0x1c1   : > { %v1001_v25 = vadd.f32 %v961_v15, %v719_v35  ;;  %v1237_v45 = vpop.f32.mrf.mxu3  ;;  %v721_v59 = vpop.f32.mrf.mxu1 }
 0x1c2   : > { %v722_v60 = vadd.f32 %v721_v59, %v4898_v61 }
 0x1c3   : > { %v1277_v26 = vadd.f32 %v1237_v45, %v1001_v25 }
 0x1c4   : > { %v1515_v28 = vpop.f32.mrf.mxu0  ;;  %3168 = vmatmul.msk.f32.gmra.mxu1 %vm311_vm0, %v4893_v1 }
 0x1c5   : > { %v4494_v44 = vadd.f32 %v1512_v4, %v1277_v26  ;;  %3232 = vmatmul.msk.f32.gmra.mxu2 %vm311_vm0, %v4072_v49  ;;  %v3265_v4 = vld [vmem:[%s3630_s23 + $0xd9] sm:$0xff]  ;;  %v3266_v26 = vld [vmem:[%s3630_s23 + $0xe1] sm:$0xff] }
 0x1c6   : > { %3296 = vmatmul.msk.f32.gmra.mxu3 %vm311_vm0, %v3264_v41  ;;  %v4899_v49 = vld [vmem:[#allocation28_spill] sm:$0xff] }
 0x1c7   : > { %3360 = vmatmul.msk.f32.gmra.mxu0 %vm311_vm0, %v4104_v9 }
 0x1c8   : > { %v964_v36 = vpop.f32.mrf.mxu2 }
 0x1c9   : > { %v1002_v54 = vadd.f32 %v964_v36, %v722_v60  ;;  %v1240_v55 = vpop.f32.mrf.mxu3  ;;  %v724_v13 = vpop.f32.mrf.mxu1 }
 0x1ca   : > { %v725_v1 = vadd.f32 %v724_v13, %v4899_v49  ;;  %v3267_v13 = vld [vmem:[%s3630_s23 + $0xf1] sm:$0xff] }
 0x1cb   : > { %v1278_v40 = vadd.f32 %v1240_v55, %v1002_v54 }
 0x1cc   : > { %v1518_v52 = vpop.f32.mrf.mxu0  ;;  %3169 = vmatmul.msk.f32.gmra.mxu1 %vm311_vm0, %v4896_v62 }
 0x1cd   : > { %v4505_v42 = vadd.f32 %v1515_v28, %v1278_v40  ;;  %3233 = vmatmul.msk.f32.gmra.mxu2 %vm311_vm0, %v4092_v2  ;;  %v4900_v2 = vld [vmem:[#allocation31_spill] sm:$0xff] }
 0x1ce   : > { %3297 = vmatmul.msk.f32.gmra.mxu3 %vm311_vm0, %v3265_v4 }
 0x1cf   : > { %3361 = vmatmul.msk.f32.gmra.mxu0 %vm311_vm0, %v4121_v38 }
 0x1d0   : > { %v967_v35 = vpop.f32.mrf.mxu2 }
 0x1d1   : > { %v1003_v15 = vadd.f32 %v967_v35, %v725_v1  ;;  %v1243_v25 = vpop.f32.mrf.mxu3  ;;  %v727_v45 = vpop.f32.mrf.mxu1 }
 0x1d2   : > { %v728_v62 = vadd.f32 %v727_v45, %v4900_v2 }
 0x1d3   : > { %v1279_v59 = vadd.f32 %v1243_v25, %v1003_v15  ;;  %v3268_v25 = vld [vmem:[%s3630_s23 + $0xf9] sm:$0xff] }
 0x1d4   : > { %v1521_v41 = vpop.f32.mrf.mxu0  ;;  %3170 = vmatmul.msk.f32.gmra.mxu1 %vm311_vm0, %v4104_v9 }
 0x1d5   : > { %v4516_v28 = vadd.f32 %v1518_v52, %v1279_v59  ;;  %3234 = vmatmul.msk.f32.gmra.mxu2 %vm311_vm0, %v4107_v63  ;;  %v4901_v63 = vld [vmem:[#allocation33_spill] sm:$0xff]  ;;  %v4902_v59 = vld [vmem:[#allocation34_spill] sm:$0xff] }
 0x1d6   : > { %3298 = vmatmul.msk.f32.gmra.mxu3 %vm311_vm0, %v3266_v26 }
 0x1d7   : > { %3362 = vmatmul.msk.f32.gmra.mxu0 %vm311_vm0, %v4138_v3 }
 0x1d8   : > { %v970_v61 = vpop.f32.mrf.mxu2 }
 0x1d9   : > { %v1004_v60 = vadd.f32 %v970_v61, %v728_v62  ;;  %v1246_v36 = vpop.f32.mrf.mxu3  ;;  %v1703_v54 = vpop.f32.mrf.mxu1 }
 0x1da   : > { %v1799_v4 = vadd.f32 %v1703_v54, %v4901_v63 }
 0x1db   : > { %v1280_v55 = vadd.f32 %v1246_v36, %v1004_v60 }
 0x1dc   : > { %v2529_v40 = vpop.f32.mrf.mxu0  ;;  %3171 = vmatmul.msk.f32.gmra.mxu1 %vm311_vm0, %v4121_v38  ;;  %v4541_v38 = vld [vmem:[%s4801_s2] ss:$0 sm:$0xff] }
 0x1dd   : > { %v4527_v9 = vadd.f32 %v1521_v41, %v1280_v55  ;;  %3235 = vmatmul.msk.f32.gmra.mxu2 %vm311_vm0, %v4124_v7 }
 0x1de   : > { %3299 = vmatmul.msk.f32.gmra.mxu3 %vm311_vm0, %v3267_v13  ;;  %v4903_v13 = vld [vmem:[#allocation35_spill] sm:$0xff] }
 0x1df   : > { %3363 = vmatmul.msk.f32.gmra.mxu0 %vm311_vm0, %v4155_v11 }
 0x1e0   : > { %v1979_v52 = vpop.f32.mrf.mxu2 }
 0x1e1   : > { %v2075_v49 = vadd.f32 %v1979_v52, %v1799_v4  ;;  %v2254_v1 = vpop.f32.mrf.mxu3  ;;  %v1706_v35 = vpop.f32.mrf.mxu1 }
 0x1e2   : > { %v1800_v26 = vadd.f32 %v1706_v35, %v4902_v59 }
 0x1e3   : > { %v2350_v15 = vadd.f32 %v2254_v1, %v2075_v49 }
 0x1e4   : > { %v2532_v7 = vpop.f32.mrf.mxu0  ;;  %3172 = vmatmul.msk.f32.gmra.mxu1 %vm311_vm0, %v4138_v3 }
 0x1e5   : > { %v2625_v45 = vadd.f32 %v2529_v40, %v2350_v15  ;;  %3236 = vmatmul.msk.f32.gmra.mxu2 %vm311_vm0, %v4141_v48  ;;  %v3269_v48 = vld [vmem:[%s3630_s23 + $0x109] sm:$0xff]  ;;  %v3270_v15 = vld [vmem:[%s3630_s23 + $0x111] sm:$0xff] }
 0x1e6   : > { %3300 = vmatmul.msk.f32.gmra.mxu3 %vm311_vm0, %v3268_v25 }
 0x1e7   : > { %3364 = vmatmul.msk.f32.gmra.mxu0 %vm311_vm0, %v4172_v21  ;;  %v2661_v41 = vadd.f32 %v4541_v38, %v2625_v45 }
 0x1e8   : > { %v1982_v2 = vpop.f32.mrf.mxu2 }
 0x1e9   : > { %v2693_v62 = vmax.f32 %v2661_v41, 0.0  ;;  %v2076_v61 = vadd.f32 %v1982_v2, %v1800_v26  ;;  %v2257_v60 = vpop.f32.mrf.mxu3  ;;  %v1709_v36 = vpop.f32.mrf.mxu1 }
 0x1ea   : > { %v1801_v40 = vadd.f32 %v1709_v36, %v4903_v13 }
 0x1eb   : > { %2725 = vst [vmem:[%s4555_s11] sm:$0xff] %v2693_v62  ;;  %v2351_v3 = vadd.f32 %v2257_v60, %v2076_v61  ;;  %v3271_v60 = vld [vmem:[%s3630_s23 + $0x121] sm:$0xff] }
 0x1ec   : > { %v2535_v54 = vpop.f32.mrf.mxu0  ;;  %3173 = vmatmul.msk.f32.gmra.mxu1 %vm311_vm0, %v4155_v11 }
 0x1ed   : > { %v2626_v55 = vadd.f32 %v2532_v7, %v2351_v3  ;;  %3237 = vmatmul.msk.f32.gmra.mxu2 %vm311_vm0, %v4158_v19  ;;  %v4904_v7 = vld [vmem:[#allocation36_spill] sm:$0xff]  ;;  %v4905_v3 = vld [vmem:[#allocation37_spill] sm:$0xff] }
 0x1ee   : > { %3301 = vmatmul.msk.f32.gmra.mxu3 %vm311_vm0, %v3269_v48 }
 0x1ef   : > { %3365 = vmatmul.msk.f32.gmra.mxu0 %vm311_vm0, %v4189_v37  ;;  %v2662_v63 = vadd.f32 %v4541_v38, %v2626_v55 }
 0x1f0   : > { %v1985_v4 = vpop.f32.mrf.mxu2 }
 0x1f1   : > { %v2694_v52 = vmax.f32 %v2662_v63, 0.0  ;;  %v2077_v49 = vadd.f32 %v1985_v4, %v1801_v40  ;;  %v2260_v1 = vpop.f32.mrf.mxu3  ;;  %v1712_v35 = vpop.f32.mrf.mxu1 }
 0x1f2   : > { %v1802_v45 = vadd.f32 %v1712_v35, %v4904_v7 }
 0x1f3   : > { %2726 = vst [vmem:[%s4555_s11 + $0x8] sm:$0xff] %v2694_v52  ;;  %v2352_v11 = vadd.f32 %v2260_v1, %v2077_v49  ;;  %v3272_v52 = vld [vmem:[%s3630_s23 + $0x129] sm:$0xff] }
 0x1f4   : > { %v2538_v19 = vpop.f32.mrf.mxu0  ;;  %3174 = vmatmul.msk.f32.gmra.mxu1 %vm311_vm0, %v4172_v21  ;;  %v4906_v1 = vld [vmem:[#allocation38_spill] sm:$0xff] }
 0x1f5   : > { %v2627_v25 = vadd.f32 %v2535_v54, %v2352_v11  ;;  %3238 = vmatmul.msk.f32.gmra.mxu2 %vm311_vm0, %v4175_v23 }
 0x1f6   : > { %3302 = vmatmul.msk.f32.gmra.mxu3 %vm311_vm0, %v3270_v15 }
 0x1f7   : > { %3366 = vmatmul.msk.f32.gmra.mxu0 %vm311_vm0, %v4206_v50  ;;  %v2663_v59 = vadd.f32 %v4541_v38, %v2627_v25 }
 0x1f8   : > { %v1988_v26 = vpop.f32.mrf.mxu2 }
 0x1f9   : > { %v2695_v41 = vmax.f32 %v2663_v59, 0.0  ;;  %v2078_v2 = vadd.f32 %v1988_v26, %v1802_v45  ;;  %v2263_v62 = vpop.f32.mrf.mxu3  ;;  %v1715_v61 = vpop.f32.mrf.mxu1  ;;  %v3273_v59 = vld [vmem:[%s3630_s23 + $0x139] sm:$0xff] }
 0x1fa   : > { %v1803_v48 = vadd.f32 %v1715_v61, %v4905_v3  ;;  %v3274_v3 = vld [vmem:[%s3630_s23 + $0x141] sm:$0xff] }
 0x1fb   : > { %2727 = vst [vmem:[%s4555_s11 + $0x10] sm:$0xff] %v2695_v41  ;;  %v2353_v21 = vadd.f32 %v2263_v62, %v2078_v2  ;;  %v4907_v41 = vld [vmem:[#allocation39_spill] sm:$0xff] }
 0x1fc   : > { %v2541_v23 = vpop.f32.mrf.mxu0  ;;  %3175 = vmatmul.msk.f32.gmra.mxu1 %vm311_vm0, %v4189_v37 }
 0x1fd   : > { %v2628_v36 = vadd.f32 %v2538_v19, %v2353_v21  ;;  %3239 = vmatmul.msk.f32.gmra.mxu2 %vm311_vm0, %v4192_v27 }
 0x1fe   : > { %3303 = vmatmul.msk.f32.gmra.mxu3 %vm311_vm0, %v3271_v60 }
 0x1ff   : > { %3367 = vmatmul.msk.f32.gmra.mxu0 %vm311_vm0, %v4223_v18  ;;  %v2664_v54 = vadd.f32 %v4541_v38, %v2628_v36 }
 0x200   : > { %v1991_v55 = vpop.f32.mrf.mxu2 }
 0x201   : > { %v2696_v13 = vmax.f32 %v2664_v54, 0.0  ;;  %v2079_v40 = vadd.f32 %v1991_v55, %v1803_v48  ;;  %v2266_v63 = vpop.f32.mrf.mxu3  ;;  %v1718_v4 = vpop.f32.mrf.mxu1  ;;  %v4908_v54 = vld [vmem:[#allocation40_spill] sm:$0xff] }
 0x202   : > { %v1804_v35 = vadd.f32 %v1718_v4, %v4906_v1  ;;  %v4909_v1 = vld [vmem:[#allocation41_spill] sm:$0xff] }
 0x203   : > { %2728 = vst [vmem:[%s4555_s11 + $0x18] sm:$0xff] %v2696_v13  ;;  %v2354_v37 = vadd.f32 %v2266_v63, %v2079_v40 }
 0x204   : > { %v2544_v27 = vpop.f32.mrf.mxu0  ;;  %3176 = vmatmul.msk.f32.gmra.mxu1 %vm311_vm0, %v4206_v50 }
 0x205   : > { %v2629_v49 = vadd.f32 %v2541_v23, %v2354_v37  ;;  %3240 = vmatmul.msk.f32.gmra.mxu2 %vm311_vm0, %v4209_v34 }
 0x206   : > { %3304 = vmatmul.msk.f32.gmra.mxu3 %vm311_vm0, %v3272_v52 }
 0x207   : > { %3368 = vmatmul.msk.f32.gmra.mxu0 %vm311_vm0, %v4240_v31  ;;  %v2665_v11 = vadd.f32 %v4541_v38, %v2629_v49 }
 0x208   : > { %v1994_v15 = vpop.f32.mrf.mxu2 }
 0x209   : > { %v2697_v19 = vmax.f32 %v2665_v11, 0.0  ;;  %v2080_v25 = vadd.f32 %v1994_v15, %v1804_v35  ;;  %v2269_v7 = vpop.f32.mrf.mxu3  ;;  %v1721_v45 = vpop.f32.mrf.mxu1 }
 0x20a   : > { %v1805_v2 = vadd.f32 %v1721_v45, %v4907_v41 }
 0x20b   : > { %2729 = vst [vmem:[%s4555_s11 + $0x20] sm:$0xff] %v2697_v19  ;;  %v2355_v50 = vadd.f32 %v2269_v7, %v2080_v25 }
 0x20c   : > { %v2547_v34 = vpop.f32.mrf.mxu0  ;;  %3177 = vmatmul.msk.f32.gmra.mxu1 %vm311_vm0, %v4223_v18 }
 0x20d   : > { %v2630_v26 = vadd.f32 %v2544_v27, %v2355_v50  ;;  %3241 = vmatmul.msk.f32.gmra.mxu2 %vm311_vm0, %v4226_v39  ;;  %v3275_v27 = vld [vmem:[%s3630_s23 + $0x151] sm:$0xff]  ;;  %v3276_v50 = vld [vmem:[%s3630_s23 + $0x159] sm:$0xff] }
 0x20e   : > { %3305 = vmatmul.msk.f32.gmra.mxu3 %vm311_vm0, %v3273_v59 }
 0x20f   : > { %3369 = vmatmul.msk.f32.gmra.mxu0 %vm311_vm0, %v4257_v17  ;;  %v2666_v62 = vadd.f32 %v4541_v38, %v2630_v26 }
 0x210   : > { %v1997_v61 = vpop.f32.mrf.mxu2 }
 0x211   : > { %v2698_v21 = vmax.f32 %v2666_v62, 0.0  ;;  %v2081_v60 = vadd.f32 %v1997_v61, %v1805_v2  ;;  %v2272_v23 = vpop.f32.mrf.mxu3  ;;  %v1724_v36 = vpop.f32.mrf.mxu1 }
 0x212   : > { %v1806_v55 = vadd.f32 %v1724_v36, %v4908_v54  ;;  %v3213_v36 = vld [vmem:[%s3630_s23 + $0x168] sm:$0xff] }
 0x213   : > { %2730 = vst [vmem:[%s4555_s11 + $0x28] sm:$0xff] %v2698_v21  ;;  %v2356_v18 = vadd.f32 %v2272_v23, %v2081_v60  ;;  %v3149_v23 = vld [vmem:[%s3630_s23 + $0x152] sm:$0xff] }
 0x214   : > { %v2550_v39 = vpop.f32.mrf.mxu0  ;;  %3178 = vmatmul.msk.f32.gmra.mxu1 %vm311_vm0, %v4240_v31 }
 0x215   : > { %v2631_v48 = vadd.f32 %v2547_v34, %v2356_v18  ;;  %3242 = vmatmul.msk.f32.gmra.mxu2 %vm311_vm0, %v4243_v43  ;;  %v4911_v34 = vld [vmem:[#allocation42_spill] sm:$0xff] }
 0x216   : > { %3306 = vmatmul.msk.f32.gmra.mxu3 %vm311_vm0, %v3274_v3 }
 0x217   : > { %3370 = vmatmul.msk.f32.gmra.mxu0 %vm311_vm0, %v4274_v0  ;;  %v2667_v13 = vadd.f32 %v4541_v38, %v2631_v48 }
 0x218   : > { %v2000_v40 = vpop.f32.mrf.mxu2 }
 0x219   : > { %v2699_v63 = vmax.f32 %v2667_v13, 0.0  ;;  %v2082_v4 = vadd.f32 %v2000_v40, %v1806_v55  ;;  %v2275_v37 = vpop.f32.mrf.mxu3  ;;  %v1727_v52 = vpop.f32.mrf.mxu1 }
 0x21a   : > { %v1807_v35 = vadd.f32 %v1727_v52, %v4909_v1  ;;  %v3214_v52 = vld [vmem:[%s3630_s23 + $0x170] sm:$0xff] }
 0x21b   : > { %2731 = vst [vmem:[%s4555_s11 + $0x30] sm:$0xff] %v2699_v63  ;;  %v2357_v31 = vadd.f32 %v2275_v37, %v2082_v4  ;;  %v3150_v37 = vld [vmem:[%s3630_s23 + $0x15a] sm:$0xff] }
 0x21c   : > { %v2553_v43 = vpop.f32.mrf.mxu0  ;;  %3179 = vmatmul.msk.f32.gmra.mxu1 %vm311_vm0, %v4257_v17 }
 0x21d   : > { %v2632_v49 = vadd.f32 %v2550_v39, %v2357_v31  ;;  %3243 = vmatmul.msk.f32.gmra.mxu2 %vm311_vm0, %v4260_v8  ;;  %v4912_v39 = vld [vmem:[#allocation43_spill] sm:$0xff] }
 0x21e   : > { %3307 = vmatmul.msk.f32.gmra.mxu3 %vm311_vm0, %v3275_v27  ;;  %v3278_v27 = vld [vmem:[%s3630_s23 + $0x171] sm:$0xff] }
 0x21f   : > { %3371 = vmatmul.msk.f32.gmra.mxu0 %vm311_vm0, %v4291_v6  ;;  %v2668_v11 = vadd.f32 %v4541_v38, %v2632_v49  ;;  %v4910_v6 = vld [vmem:[#allocation45_spill] sm:$0xff] }
 0x220   : > { %v2003_v15 = vpop.f32.mrf.mxu2 }
 0x221   : > { %v2700_v19 = vmax.f32 %v2668_v11, 0.0  ;;  %v2083_v25 = vadd.f32 %v2003_v15, %v1807_v35  ;;  %v2278_v7 = vpop.f32.mrf.mxu3  ;;  %v1730_v45 = vpop.f32.mrf.mxu1 }
 0x222   : > { %v1808_v26 = vadd.f32 %v1730_v45, %v4911_v34  ;;  %v3151_v45 = vld [vmem:[%s3630_s23 + $0x16a] sm:$0xff] }
 0x223   : > { %2732 = vst [vmem:[%s4555_s11 + $0x38] sm:$0xff] %v2700_v19  ;;  %v2358_v17 = vadd.f32 %v2278_v7, %v2083_v25 }
 0x224   : > { %v2556_v8 = vpop.f32.mrf.mxu0  ;;  %3180 = vmatmul.msk.f32.gmra.mxu1 %vm311_vm0, %v4274_v0 }
 0x225   : > { %v2633_v59 = vadd.f32 %v2553_v43, %v2358_v17  ;;  %3244 = vmatmul.msk.f32.gmra.mxu2 %vm311_vm0, %v4277_v14  ;;  %v3277_v14 = vld [vmem:[%s3630_s23 + $0x169] sm:$0xff]  ;;  %v3215_v17 = vld [vmem:[%s3630_s23 + $0x180] sm:$0xff] }
 0x226   : > { %3308 = vmatmul.msk.f32.gmra.mxu3 %vm311_vm0, %v3276_v50 }
 0x227   : > { %3372 = vmatmul.msk.f32.gmra.mxu0 %vm311_vm0, %v4910_v6  ;;  %v2669_v41 = vadd.f32 %v4541_v38, %v2633_v59  ;;  %v3343_v59 = vld [vmem:[%s3630_s23 + $0x182] sm:$0xff] }
 0x228   : > { %v2006_v2 = vpop.f32.mrf.mxu2 }
 0x229   : > { %v2701_v62 = vmax.f32 %v2669_v41, 0.0  ;;  %v2084_v61 = vadd.f32 %v2006_v2, %v1808_v26  ;;  %v2281_v21 = vpop.f32.mrf.mxu3  ;;  %v1733_v60 = vpop.f32.mrf.mxu1 }
 0x22a   : > { %v1809_v48 = vadd.f32 %v1733_v60, %v4912_v39  ;;  %v3152_v60 = vld [vmem:[%s3630_s23 + $0x172] sm:$0xff] }
 0x22b   : > { %2733 = vst [vmem:[%s4555_s11 + $0x40] sm:$0xff] %v2701_v62  ;;  %v2359_v0 = vadd.f32 %v2281_v21, %v2084_v61 }
 0x22c   : > { %v2559_v18 = vpop.f32.mrf.mxu0  ;;  %3181 = vmatmul.msk.f32.gmra.mxu1 %vm311_vm0, %v3149_v23  ;;  %v3216_v23 = vld [vmem:[%s3630_s23 + $0x188] sm:$0xff] }
 0x22d   : > { %v2634_v3 = vadd.f32 %v2556_v8, %v2359_v0  ;;  %3245 = vmatmul.msk.f32.gmra.mxu2 %vm311_vm0, %v3213_v36 }
 0x22e   : > { %3309 = vmatmul.msk.f32.gmra.mxu3 %vm311_vm0, %v3277_v14  ;;  %v3344_v14 = vld [vmem:[%s3630_s23 + $0x18a] sm:$0xff] }
 0x22f   : > { %3373 = vmatmul.msk.f32.gmra.mxu0 %vm311_vm0, %v4319_v32  ;;  %v2670_v54 = vadd.f32 %v4541_v38, %v2634_v3  ;;  %v4913_v32 = vld [vmem:[#allocation44_spill] sm:$0xff] }
 0x230   : > { %v2009_v55 = vpop.f32.mrf.mxu2 }
 0x231   : > { %v2702_v13 = vmax.f32 %v2670_v54, 0.0  ;;  %v2085_v40 = vadd.f32 %v2009_v55, %v1809_v48  ;;  %v2284_v63 = vpop.f32.mrf.mxu3  ;;  %v1736_v4 = vpop.f32.mrf.mxu1 }
 0x232   : > { %v1810_v1 = vadd.f32 %v1736_v4, %v4913_v32 }
 0x233   : > { %2734 = vst [vmem:[%s4555_s11 + $0x48] sm:$0xff] %v2702_v13  ;;  %v2360_v31 = vadd.f32 %v2284_v63, %v2085_v40  ;;  %v3217_v63 = vld [vmem:[%s3630_s23 + $0x198] sm:$0xff] }
 0x234   : > { %v2562_v43 = vpop.f32.mrf.mxu0  ;;  %3182 = vmatmul.msk.f32.gmra.mxu1 %vm311_vm0, %v3150_v37  ;;  %v3281_v37 = vld [vmem:[%s3630_s23 + $0x199] sm:$0xff] }
 0x235   : > { %v2635_v49 = vadd.f32 %v2559_v18, %v2360_v31  ;;  %3246 = vmatmul.msk.f32.gmra.mxu2 %vm311_vm0, %v3214_v52  ;;  %v4915_v18 = vld [vmem:[#allocation47_spill] sm:$0xff]  ;;  %v3345_v31 = vld [vmem:[%s3630_s23 + $0x19a] sm:$0xff] }
 0x236   : > { %3310 = vmatmul.msk.f32.gmra.mxu3 %vm311_vm0, %v3278_v27 }
 0x237   : > { %3374 = vmatmul.msk.f32.gmra.mxu0 %vm311_vm0, %v4335_v10  ;;  %v2671_v35 = vadd.f32 %v4541_v38, %v2635_v49  ;;  %v4914_v10 = vld [vmem:[#allocation46_spill] sm:$0xff] }
 0x238   : > { %v2012_v11 = vpop.f32.mrf.mxu2 }
 0x239   : > { %v2703_v15 = vmax.f32 %v2671_v35, 0.0  ;;  %v2086_v19 = vadd.f32 %v2012_v11, %v1810_v1  ;;  %v2287_v25 = vpop.f32.mrf.mxu3  ;;  %v1739_v7 = vpop.f32.mrf.mxu1 }
 0x23a   : > { %v1811_v34 = vadd.f32 %v1739_v7, %v4914_v10 }
 0x23b   : > { %2735 = vst [vmem:[%s4555_s11 + $0x50] sm:$0xff] %v2703_v15  ;;  %v2361_v50 = vadd.f32 %v2287_v25, %v2086_v19  ;;  %v3218_v15 = vld [vmem:[%s3630_s23 + $0x1a0] sm:$0xff] }
 0x23c   : > { %v2565_v8 = vpop.f32.mrf.mxu0  ;;  %3183 = vmatmul.msk.f32.gmra.mxu1 %vm311_vm0, %v3151_v45  ;;  %v3282_v25 = vld [vmem:[%s3630_s23 + $0x1a1] sm:$0xff] }
 0x23d   : > { %v2636_v6 = vadd.f32 %v2562_v43, %v2361_v50  ;;  %3247 = vmatmul.msk.f32.gmra.mxu2 %vm311_vm0, %v3215_v17  ;;  %v3346_v45 = vld [vmem:[%s3630_s23 + $0x1a2] sm:$0xff]  ;;  %s3384_s23 = sshll.u32 %s3520_s15, 8  ;;  %s2758_s15 = scalar_lea.sflag [#allocation3], %s221_s7 }
 0x23e   : > { %3311 = vmatmul.msk.f32.gmra.mxu3 %vm311_vm0, %v4323_v46  ;;  %s2773_s21 = scalar_lea.hbm %s4802_s3, %s3384_s23 }
 0x23f   : > { %3375 = vmatmul.msk.f32.gmra.mxu0 %vm311_vm0, %v3343_v59  ;;  %v2672_v26 = vadd.f32 %v4541_v38, %v2636_v6  ;;  %s2776_s27 = sshll.u32 %s2773_s21, 4  ;;  %s2777_s27 = int_to_ptr.hbm [resolvable:$true] %s2776_s27 }
 0x240   : > { %v2015_v41 = vpop.f32.mrf.mxu2  ;;  %s3464_s28 = sshra.s32 %s2777_s27, 4  ;;  %s3465_s28 = int_to_ptr.hbm [resolvable:$true] %s3464_s28 }
 0x241   : > { %v2704_v2 = vmax.f32 %v2672_v26, 0.0  ;;  %v2087_v62 = vadd.f32 %v2015_v41, %v1811_v34  ;;  %v2290_v61 = vpop.f32.mrf.mxu3  ;;  %v1742_v21 = vpop.f32.mrf.mxu1  ;;  %s3466_s29 = scalar_lea.hbm %s3465_s28, 256  ;;  %p3471_p1 = scmp.lt.s32.totalorder %s3465_s28, %s4802_s3 }
 0x242   : > { %v1812_v3 = vadd.f32 %v1742_v21, %v4915_v18  ;;  %p3467_p12 = scmp.ne.s32.totalorder %s3465_s28, %s3466_s29  ;;  %p3472_p2 = scmp.lt.s32.totalorder %s3470_s5, %s3466_s29 }
 0x243   : > { %2736 = vst [vmem:[%s4555_s11 + $0x58] sm:$0xff] %v2704_v2  ;;  %v2362_v36 = vadd.f32 %v2290_v61, %v2087_v62 }
 0x244   : > { %v2568_v0 = vpop.f32.mrf.mxu0  ;;  %3184 = vmatmul.msk.f32.gmra.mxu1 %vm311_vm0, %v3152_v60  ;;  %p3468_p13 = pnand %p3467_p12, %p3592_p4  ;;  %p3473_p3 = por %p3472_p2, %p3471_p1 }
 0x245   : > { %v2637_v46 = vadd.f32 %v2565_v8, %v2362_v36  ;;  %3248 = vmatmul.msk.f32.gmra.mxu2 %vm311_vm0, %v3216_v23 }
 0x246   : > { %3312 = vmatmul.msk.f32.gmra.mxu3 %vm311_vm0, %v4339_v20  ;;  %p3469_p0 = pneg %p3468_p13 }
 0x247   : > { %3376 = vmatmul.msk.f32.gmra.mxu0 %vm311_vm0, %v3344_v14  ;;  %v2673_v39 = vadd.f32 %v4541_v38, %v2637_v46 }
 0x248   : > { %v2018_v48 = vpop.f32.mrf.mxu2  ;;  %p3474_p5 = pnand %p3473_p3, %p3469_p0 }
 0x249   : > { %v2705_v54 = vmax.f32 %v2673_v39, 0.0  ;;  %v2088_v55 = vadd.f32 %v2018_v48, %v1812_v3  ;;  %v2293_v13 = vpop.f32.mrf.mxu3  ;;  %v1745_v40 = vpop.f32.mrf.mxu1 }
 0x24a   : > { %v1813_v27 = vadd.f32 %v1745_v40, %v4341_v33 }
 0x24b   : > { %2737 = vst [vmem:[%s4555_s11 + $0x60] sm:$0xff] %v2705_v54  ;;  %v2363_v4 = vadd.f32 %v2293_v13, %v2088_v55 }
 0x24c   : > { %v2571_v52 = vpop.f32.mrf.mxu0  ;;  %3185 = vmatmul.msk.f32.gmra.mxu1 %vm311_vm0, %v3343_v59 }
 0x24d   : > { %v2638_v20 = vadd.f32 %v2568_v0, %v2363_v4  ;;  %3249 = vmatmul.msk.f32.gmra.mxu2 %vm311_vm0, %v3217_v63 }
 0x24e   : > { %3313 = vmatmul.msk.f32.gmra.mxu3 %vm311_vm0, %v3281_v37 }
 0x24f   : > { %3377 = vmatmul.msk.f32.gmra.mxu0 %vm311_vm0, %v3345_v31  ;;  %v2674_v43 = vadd.f32 %v4541_v38, %v2638_v20 }
 0x250   : > { %v2021_v49 = vpop.f32.mrf.mxu2 }
 0x251   : > { %v2706_v32 = vmax.f32 %v2674_v43, 0.0  ;;  %v2089_v1 = vadd.f32 %v2021_v49, %v1813_v27  ;;  %v2296_v35 = vpop.f32.mrf.mxu3  ;;  %v1748_v11 = vpop.f32.mrf.mxu1 }
 0x252   : > { %v1814_v33 = vadd.f32 %v1748_v11, %v4350_v12 }
 0x253   : > { %2738 = vst [vmem:[%s4555_s11 + $0x68] sm:$0xff] %v2706_v32  ;;  %v2364_v19 = vadd.f32 %v2296_v35, %v2089_v1 }
 0x254   : > { %v2574_v7 = vpop.f32.mrf.mxu0  ;;  %3186 = vmatmul.msk.f32.gmra.mxu1 %vm311_vm0, %v3344_v14 }
 0x255   : > { %v2639_v17 = vadd.f32 %v2571_v52, %v2364_v19  ;;  %3250 = vmatmul.msk.f32.gmra.mxu2 %vm311_vm0, %v3218_v15 }
 0x256   : > { %3314 = vmatmul.msk.f32.gmra.mxu3 %vm311_vm0, %v3282_v25 }
 0x257   : > { %3378 = vmatmul.msk.f32.gmra.mxu0 %vm311_vm0, %v3346_v45  ;;  %v2675_v50 = vadd.f32 %v4541_v38, %v2639_v17 }
 0x258   : > { %v2024_v8 = vpop.f32.mrf.mxu2 }
 0x259   : > { %v2707_v59 = vmax.f32 %v2675_v50, 0.0  ;;  %v2090_v6 = vadd.f32 %v2024_v8, %v1814_v33  ;;  %v2299_v10 = vpop.f32.mrf.mxu3  ;;  %v1751_v34 = vpop.f32.mrf.mxu1 }
 0x25a   : > { %v1815_v62 = vadd.f32 %v1751_v34, %v4361_v30 }
 0x25b   : > { %2739 = vst [vmem:[%s4555_s11 + $0x70] sm:$0xff] %v2707_v59  ;;  %v2365_v26 = vadd.f32 %v2299_v10, %v2090_v6 }
 0x25c   : > { %v2577_v41 = vpop.f32.mrf.mxu0 }
 0x25d   : > { %v2640_v2 = vadd.f32 %v2574_v7, %v2365_v26 }
 0x25f   : > { %v2676_v61 = vadd.f32 %v4541_v38, %v2640_v2 }
 0x260   : > { %v2027_v21 = vpop.f32.mrf.mxu2 }
 0x261   : > { %v2708_v60 = vmax.f32 %v2676_v61, 0.0  ;;  %v2091_v12 = vadd.f32 %v2027_v21, %v1815_v62  ;;  %v2302_v23 = vpop.f32.mrf.mxu3  ;;  %v1754_v36 = vpop.f32.mrf.mxu1 }
 0x262   : > { %v1816_v18 = vadd.f32 %v1754_v36, %v4372_v16 }
 0x263   : > { %2740 = vst [vmem:[%s4555_s11 + $0x78] sm:$0xff] %v2708_v60  ;;  %v2366_v0 = vadd.f32 %v2302_v23, %v2091_v12 }
 0x264   : > { %v2580_v14 = vpop.f32.mrf.mxu0 }
 0x265   : > { %v2641_v46 = vadd.f32 %v2577_v41, %v2366_v0 }
 0x267   : > { %v2677_v3 = vadd.f32 %v4541_v38, %v2641_v46 }
 0x268   : > { %v2030_v39 = vpop.f32.mrf.mxu2 }
 0x269   : > { %v2709_v48 = vmax.f32 %v2677_v3, 0.0  ;;  %v2092_v30 = vadd.f32 %v2030_v39, %v1816_v18  ;;  %v2305_v54 = vpop.f32.mrf.mxu3  ;;  %v1757_v55 = vpop.f32.mrf.mxu1 }
 0x26a   : > { %v1817_v4 = vadd.f32 %v1757_v55, %v4383_v47 }
 0x26b   : > { %2741 = vst [vmem:[%s4555_s11 + $0x80] sm:$0xff] %v2709_v48  ;;  %v2367_v13 = vadd.f32 %v2305_v54, %v2092_v30 }
 0x26c   : > { %v2583_v40 = vpop.f32.mrf.mxu0 }
 0x26d   : > { %v2642_v63 = vadd.f32 %v2580_v14, %v2367_v13 }
 0x26f   : > { %v2678_v37 = vadd.f32 %v4541_v38, %v2642_v63 }
 0x270   : > { %v2033_v52 = vpop.f32.mrf.mxu2 }
 0x271   : > { %v2710_v31 = vmax.f32 %v2678_v37, 0.0  ;;  %v2093_v16 = vadd.f32 %v2033_v52, %v1817_v4  ;;  %v2308_v20 = vpop.f32.mrf.mxu3  ;;  %v1760_v27 = vpop.f32.mrf.mxu1 }
 0x272   : > { %v1818_v1 = vadd.f32 %v1760_v27, %v4395_v58 }
 0x273   : > { %2742 = vst [vmem:[%s4555_s11 + $0x88] sm:$0xff] %v2710_v31  ;;  %v2368_v43 = vadd.f32 %v2308_v20, %v2093_v16 }
 0x274   : > { %v2586_v49 = vpop.f32.mrf.mxu0 }
 0x275   : > { %v2643_v32 = vadd.f32 %v2583_v40, %v2368_v43 }
 0x277   : > { %v2679_v35 = vadd.f32 %v4541_v38, %v2643_v32 }
 0x278   : > { %v2036_v11 = vpop.f32.mrf.mxu2 }
 0x279   : > { %v2711_v15 = vmax.f32 %v2679_v35, 0.0  ;;  %v2094_v47 = vadd.f32 %v2036_v11, %v1818_v1  ;;  %v2311_v19 = vpop.f32.mrf.mxu3  ;;  %v1763_v25 = vpop.f32.mrf.mxu1 }
 0x27a   : > { %v1819_v33 = vadd.f32 %v1763_v25, %v4406_v5 }
 0x27b   : > { %2743 = vst [vmem:[%s4555_s11 + $0x90] sm:$0xff] %v2711_v15  ;;  %v2369_v7 = vadd.f32 %v2311_v19, %v2094_v47 }
 0x27c   : > { %v2589_v45 = vpop.f32.mrf.mxu0 }
 0x27d   : > { %v2644_v17 = vadd.f32 %v2586_v49, %v2369_v7 }
 0x27f   : > { %v2680_v50 = vadd.f32 %v4541_v38, %v2644_v17 }
 0x280   : > { %v2039_v8 = vpop.f32.mrf.mxu2 }
 0x281   : > { %v2712_v59 = vmax.f32 %v2680_v50, 0.0  ;;  %v2095_v58 = vadd.f32 %v2039_v8, %v1819_v33  ;;  %v2314_v6 = vpop.f32.mrf.mxu3  ;;  %v1766_v10 = vpop.f32.mrf.mxu1 }
 0x282   : > { %v1820_v2 = vadd.f32 %v1766_v10, %v4417_v57 }
 0x283   : > { %2744 = vst [vmem:[%s4555_s11 + $0x98] sm:$0xff] %v2712_v59  ;;  %v2370_v34 = vadd.f32 %v2314_v6, %v2095_v58 }
 0x284   : > { %v2592_v26 = vpop.f32.mrf.mxu0 }
 0x285   : > { %v2645_v41 = vadd.f32 %v2589_v45, %v2370_v34 }
 0x287   : > { %v2681_v62 = vadd.f32 %v4541_v38, %v2645_v41 }
 0x288   : > { %v2042_v61 = vpop.f32.mrf.mxu2 }
 0x289   : > { %v2713_v21 = vmax.f32 %v2681_v62, 0.0  ;;  %v2096_v5 = vadd.f32 %v2042_v61, %v1820_v2  ;;  %v2317_v60 = vpop.f32.mrf.mxu3  ;;  %v1769_v12 = vpop.f32.mrf.mxu1 }
 0x28a   : > { %v1821_v14 = vadd.f32 %v1769_v12, %v4428_v53 }
 0x28b   : > { %2745 = vst [vmem:[%s4555_s11 + $0xa0] sm:$0xff] %v2713_v21  ;;  %v2371_v23 = vadd.f32 %v2317_v60, %v2096_v5 }
 0x28c   : > { %v2595_v36 = vpop.f32.mrf.mxu0 }
 0x28d   : > { %v2646_v0 = vadd.f32 %v2592_v26, %v2371_v23 }
 0x28f   : > { %v2682_v46 = vadd.f32 %v4541_v38, %v2646_v0 }
 0x290   : > { %v2045_v18 = vpop.f32.mrf.mxu2 }
 0x291   : > { %v2714_v3 = vmax.f32 %v2682_v46, 0.0  ;;  %v2097_v57 = vadd.f32 %v2045_v18, %v1821_v14  ;;  %v2320_v39 = vpop.f32.mrf.mxu3  ;;  %v1772_v48 = vpop.f32.mrf.mxu1 }
 0x292   : > { %v1822_v13 = vadd.f32 %v1772_v48, %v4439_v24 }
 0x293   : > { %2746 = vst [vmem:[%s4555_s11 + $0xa8] sm:$0xff] %v2714_v3  ;;  %v2372_v30 = vadd.f32 %v2320_v39, %v2097_v57 }
 0x294   : > { %v2598_v54 = vpop.f32.mrf.mxu0 }
 0x295   : > { %v2647_v55 = vadd.f32 %v2595_v36, %v2372_v30 }
 0x297   : > { %v2683_v40 = vadd.f32 %v4541_v38, %v2647_v55 }
 0x298   : > { %v2048_v63 = vpop.f32.mrf.mxu2 }
 0x299   : > { %v2715_v4 = vmax.f32 %v2683_v40, 0.0  ;;  %v2098_v53 = vadd.f32 %v2048_v63, %v1822_v13  ;;  %v2323_v37 = vpop.f32.mrf.mxu3  ;;  %v1775_v52 = vpop.f32.mrf.mxu1 }
 0x29a   : > { %v1823_v27 = vadd.f32 %v1775_v52, %v4450_v29 }
 0x29b   : > { %2747 = vst [vmem:[%s4555_s11 + $0xb0] sm:$0xff] %v2715_v4  ;;  %v2373_v31 = vadd.f32 %v2323_v37, %v2098_v53 }
 0x29c   : > { %v2601_v16 = vpop.f32.mrf.mxu0 }
 0x29d   : > { %v2648_v20 = vadd.f32 %v2598_v54, %v2373_v31 }
 0x29f   : > { %v2684_v43 = vadd.f32 %v4541_v38, %v2648_v20 }
 0x2a0   : > { %v2051_v49 = vpop.f32.mrf.mxu2 }
 0x2a1   : > { %v2716_v32 = vmax.f32 %v2684_v43, 0.0  ;;  %v2099_v24 = vadd.f32 %v2051_v49, %v1823_v27  ;;  %v2326_v1 = vpop.f32.mrf.mxu3  ;;  %v1778_v35 = vpop.f32.mrf.mxu1 }
 0x2a2   : > { %v1824_v19 = vadd.f32 %v1778_v35, %v4461_v51 }
 0x2a3   : > { %2748 = vst [vmem:[%s4555_s11 + $0xb8] sm:$0xff] %v2716_v32  ;;  %v2374_v11 = vadd.f32 %v2326_v1, %v2099_v24 }
 0x2a4   : > { %v2604_v15 = vpop.f32.mrf.mxu0 }
 0x2a5   : > { %v2649_v47 = vadd.f32 %v2601_v16, %v2374_v11 }
 0x2a7   : > { %v2685_v25 = vadd.f32 %v4541_v38, %v2649_v47 }
 0x2a8   : > { %v2054_v7 = vpop.f32.mrf.mxu2 }
 0x2a9   : > { %v2717_v45 = vmax.f32 %v2685_v25, 0.0  ;;  %v2100_v29 = vadd.f32 %v2054_v7, %v1824_v19  ;;  %v2329_v17 = vpop.f32.mrf.mxu3  ;;  %v1781_v33 = vpop.f32.mrf.mxu1 }
 0x2aa   : > { %v1825_v58 = vadd.f32 %v1781_v33, %v4472_v22 }
 0x2ab   : > { %2749 = vst [vmem:[%s4555_s11 + $0xc0] sm:$0xff] %v2717_v45  ;;  %v2375_v50 = vadd.f32 %v2329_v17, %v2100_v29 }
 0x2ac   : > { %v2607_v8 = vpop.f32.mrf.mxu0 }
 0x2ad   : > { %v2650_v59 = vadd.f32 %v2604_v15, %v2375_v50 }
 0x2af   : > { %v2686_v6 = vadd.f32 %v4541_v38, %v2650_v59 }
 0x2b0   : > { %v2057_v10 = vpop.f32.mrf.mxu2 }
 0x2b1   : > { %v2718_v34 = vmax.f32 %v2686_v6, 0.0  ;;  %v2101_v51 = vadd.f32 %v2057_v10, %v1825_v58  ;;  %v2332_v26 = vpop.f32.mrf.mxu3  ;;  %v1784_v41 = vpop.f32.mrf.mxu1 }
 0x2b2   : > { %v1826_v21 = vadd.f32 %v1784_v41, %v4483_v56 }
 0x2b3   : > { %2750 = vst [vmem:[%s4555_s11 + $0xc8] sm:$0xff] %v2718_v34  ;;  %v2376_v2 = vadd.f32 %v2332_v26, %v2101_v51 }
 0x2b4   : > { %v2610_v62 = vpop.f32.mrf.mxu0 }
 0x2b5   : > { %v2651_v61 = vadd.f32 %v2607_v8, %v2376_v2 }
 0x2b7   : > { %v2687_v5 = vadd.f32 %v4541_v38, %v2651_v61 }
 0x2b8   : > { %v2060_v60 = vpop.f32.mrf.mxu2 }
 0x2b9   : > { %v2719_v12 = vmax.f32 %v2687_v5, 0.0  ;;  %v2102_v22 = vadd.f32 %v2060_v60, %v1826_v21  ;;  %v2335_v23 = vpop.f32.mrf.mxu3  ;;  %v1787_v36 = vpop.f32.mrf.mxu1 }
 0x2ba   : > { %v1827_v18 = vadd.f32 %v1787_v36, %v4494_v44 }
 0x2bb   : > { %2751 = vst [vmem:[%s4555_s11 + $0xd0] sm:$0xff] %v2719_v12  ;;  %v2377_v0 = vadd.f32 %v2335_v23, %v2102_v22 }
 0x2bc   : > { %v2613_v14 = vpop.f32.mrf.mxu0 }
 0x2bd   : > { %v2652_v46 = vadd.f32 %v2610_v62, %v2377_v0 }
 0x2bf   : > { %v2688_v3 = vadd.f32 %v4541_v38, %v2652_v46 }
 0x2c0   : > { %v2063_v57 = vpop.f32.mrf.mxu2 }
 0x2c1   : > { %v2720_v39 = vmax.f32 %v2688_v3, 0.0  ;;  %v2103_v56 = vadd.f32 %v2063_v57, %v1827_v18  ;;  %v2338_v48 = vpop.f32.mrf.mxu3  ;;  %v1790_v30 = vpop.f32.mrf.mxu1 }
 0x2c2   : > { %v1828_v40 = vadd.f32 %v1790_v30, %v4505_v42 }
 0x2c3   : > { %2752 = vst [vmem:[%s4555_s11 + $0xd8] sm:$0xff] %v2720_v39  ;;  %v2378_v54 = vadd.f32 %v2338_v48, %v2103_v56 }
 0x2c4   : > { %v2616_v13 = vpop.f32.mrf.mxu0 }
 0x2c5   : > { %v2653_v55 = vadd.f32 %v2613_v14, %v2378_v54 }
 0x2c7   : > { %v2689_v63 = vadd.f32 %v4541_v38, %v2653_v55 }
 0x2c8   : > { %v2066_v4 = vpop.f32.mrf.mxu2 }
 0x2c9   : > { %v2721_v53 = vmax.f32 %v2689_v63, 0.0  ;;  %v2104_v44 = vadd.f32 %v2066_v4, %v1828_v40  ;;  %v2341_v37 = vpop.f32.mrf.mxu3  ;;  %v1793_v52 = vpop.f32.mrf.mxu1 }
 0x2ca   : > { %v1829_v20 = vadd.f32 %v1793_v52, %v4516_v28 }
 0x2cb   : > { %2753 = vst [vmem:[%s4555_s11 + $0xe0] sm:$0xff] %v2721_v53  ;;  %v2379_v31 = vadd.f32 %v2341_v37, %v2104_v44 }
 0x2cc   : > { %v2619_v49 = vpop.f32.mrf.mxu0 }
 0x2cd   : > { %v2654_v16 = vadd.f32 %v2616_v13, %v2379_v31 }
 0x2cf   : > { %v2690_v27 = vadd.f32 %v4541_v38, %v2654_v16 }
 0x2d0   : > { %v2069_v43 = vpop.f32.mrf.mxu2 }
 0x2d1   : > { %v2722_v32 = vmax.f32 %v2690_v27, 0.0  ;;  %v2105_v42 = vadd.f32 %v2069_v43, %v1829_v20  ;;  %v2344_v24 = vpop.f32.mrf.mxu3  ;;  %v1796_v35 = vpop.f32.mrf.mxu1 }
 0x2d2   : > { %v1830_v15 = vadd.f32 %v1796_v35, %v4527_v9 }
 0x2d3   : > { %2754 = vst [vmem:[%s4555_s11 + $0xe8] sm:$0xff] %v2722_v32  ;;  %v2380_v1 = vadd.f32 %v2344_v24, %v2105_v42 }
 0x2d4   : > { %v2622_v45 = vpop.f32.mrf.mxu0 }
 0x2d5   : > { %v2655_v11 = vadd.f32 %v2619_v49, %v2380_v1 }
 0x2d7   : > { %v2691_v47 = vadd.f32 %v4541_v38, %v2655_v11 }
 0x2d8   : > { %v2072_v28 = vpop.f32.mrf.mxu2 }
 0x2d9   : > { %v2723_v19 = vmax.f32 %v2691_v47, 0.0  ;;  %v2106_v25 = vadd.f32 %v2072_v28, %v1830_v15  ;;  %v2347_v7 = vpop.f32.mrf.mxu3 }
 0x2db   : > { %2755 = vst [vmem:[%s4555_s11 + $0xf0] sm:$0xff] %v2723_v19  ;;  %v2381_v29 = vadd.f32 %v2347_v7, %v2106_v25 }
 0x2dd   : > { %v2656_v17 = vadd.f32 %v2622_v45, %v2381_v29 }
 0x2df   : > { %v2692_v9 = vadd.f32 %v4541_v38, %v2656_v17 }
 0x2e1   : > { %v2724_v33 = vmax.f32 %v2692_v9, 0.0 }
 0x2e3   : > { %2756 = vst [vmem:[%s4555_s11 + $0xf8] sm:$0xff] %v2724_v33 }
 0x2e4   : > { %3477 = shalt.err (!%p3474_p5)
}
 0x2e5   : > { %s3530_s7 = smov 128   ;;  %s3531_s9 = smov 8  }
 0x2e6   : > { %3392 = dma.vmem_to_hbm [thread:$0]  (%p3592_p4), %s2775_s26, 4096, %s2777_s27, %s2758_s15, %s3530_s7, %s3530_s7, %s3531_s9  }
 0x2e7 PF: > { %p3398_p6 = scmp.ge.s32.totalorder %s3528_s17, 2  ;;  %s2791_s10 = sand.u32 1, %s3508_s12  }
 0x2e8   : > { %s2792_s11 = scalar_lea.sflag [#allocation3], %s2791_s10 }
 0x2e9   : > { %p3395_p7 = pnand %p3398_p6, %p3599_p8 }
 0x2eb   : > { %p3396_p9 = pneg %p3395_p7 }
 0x2ed   : > { %3503 = dma.done.wait (%p3396_p9), %s2792_s11, 4096  }
 0x2ee   : > { %3505 = vsyncadd (%p3396_p9), %s2792_s11, 4294963200  ;;  %s16_s17 = sadd.s32 1, %s3528_s17   ;;  %s4916_s12 = smov %s3512_s13 }
 0x2ef   : > { %p13_p10 = scmp.ge.s32.totalorder %s16_s17, 4   ;;  %s4917_s13 = smov %s3516_s14 }
 0x2f0   : > { %s4918_s14 = smov %s3605_s25  ;;  %s4919_s15 = smov %s3524_s16 }
 0x2f1   : > { %s4920_s16 = smov %s4922_s20  ;;  %15 = sbr.rel (!%p13_p10) target bundleno = 4 (0x4), region = 75 }
 0x2f6   :  { %2798 = vsyncpa [#allocation3], 1 }
 0x2f7   :  { %2800 = vsyncpa [#allocation3 + $0x1], 1 }

</bundles_post_ra>
